<compile_context>
chip_gen: v7x
topology: tpu7x:2x2x1
jax: 0.10.0
libtpu: 0.0.40
codegen_flags: <defaults>
</compile_context>

<pallas_src>
import functools
import re

import jax
import jax.numpy as jnp
from jax import lax
from jax.experimental import pallas as pl
from jax.experimental.pallas import tpu as pltpu


def _round_up(x, m):
    return ((x + m - 1) // m) * m


# ----------------------------------------------------------------------------- chip queries
def _tpu_generation():
    """Best-effort TPU generation (4/5/6/7/...); None if not parseable."""
    try:
        kind = jax.devices()[0].device_kind
    except Exception:
        return None
    m = re.search(r"(\d+)", kind)
    return int(m.group(1)) if m else None


def _parallel_grid_cores(gen):
    """How many TensorCores a 'parallel' grid axis is sharded over."""
    try:
        kind = jax.devices()[0].device_kind.lower()
    except Exception:
        kind = ""
    if gen is None:
        return 1
    if gen >= 7 or gen == 4:
        return 2                          # v7x: 2 TC/chip; v4: megacore
    if gen == 5 and "lite" not in kind and "5e" not in kind:
        return 2                          # v5p megacore
    return 1                              # v5e / v6e: single TensorCore


def _vmem_capacity_bytes(gen):
    try:
        cap = getattr(pltpu.get_tpu_info(), "vmem_capacity_bytes", None)
        if cap:
            return int(cap)
    except Exception:
        pass
    if gen is not None and gen >= 7:
        return 64 * 2**20                 # v7x per-TC VMEM
    return 128 * 2**20                    # v4/v5/v6


def _pick_batch_tile(B, gen, cores):
    """Pick a sublane-aligned M tile.

    * 1-TC chips (v5e/v6e): one big tile, no gratuitous grid splitting (each extra grid
      step costs ~0.35us with zero parallelism benefit). v5e gets 512-row tiles
      (128 MiB VMEM, ~820 GB/s HBM), v6e 256.
    * 2-TC chips (v7x / megacore): aim for an EVEN number of grid steps so both cores
      get equal work.
    """
    Bp = _round_up(max(B, 1), 8)
    max_tile = 512 if gen == 5 else 256
    tile = min(Bp, max_tile)
    if cores <= 1:
        return tile
    steps = pl.cdiv(Bp, tile)
    if steps % 2 == 1:
        tile = max(8, _round_up(pl.cdiv(Bp, steps + 1), 8))
    return tile


# ----------------------------------------------------------------------------- kernel
def _mlp_kernel(num_layers, eps, exact, ew_bf16, *refs):
    # refs layout:
    #   x_ref,
    #   (w_i, gamma_i (f32), beta_i (f32)) * num_layers,
    #   w_mean (lane-padded), b_mean (f32, lane-padded),
    #   out_ref (lane-padded)
    x_ref = refs[0]
    layer_refs = refs[1:1 + 3 * num_layers]
    wm_ref = refs[1 + 3 * num_layers]
    bm_ref = refs[2 + 3 * num_layers]
    out_ref = refs[3 + 3 * num_layers]

    mxu_dtype = layer_refs[0].dtype        # dtype the weights were stored in (bf16 fast path)
    x = x_ref[...].astype(mxu_dtype)

    for i in range(num_layers):
        w = layer_refs[3 * i][...]         # (in, units)
        gamma = layer_refs[3 * i + 1][...] # (1, units), f32
        beta = layer_refs[3 * i + 2][...]  # (1, units), f32

        # Linear (no bias) on the MXU, f32 accumulation.
        h = jnp.dot(x, w, preferred_element_type=jnp.float32)

        # LayerNorm over last dim (biased variance, matches torch.nn.LayerNorm).
        mu = jnp.mean(h, axis=-1, keepdims=True)
        if exact:
            # Two-pass variance: bit-level agreement with the reference (torch numerics).
            var = jnp.mean((h - mu) ** 2, axis=-1, keepdims=True)
        else:
            # One-pass E[h^2] - mu^2: two independent reductions, no serial dependency.
            msq = jnp.mean(h * h, axis=-1, keepdims=True)
            var = jnp.maximum(msq - mu * mu, 0.0)
        hn = (h - mu) * lax.rsqrt(var + eps)

        if exact:
            hn = hn * gamma + beta
            a = hn * jax.nn.sigmoid(hn)
        elif ew_bf16:
            # v6e/v7x fast path: bf16 affine + SiLU (bf16 VALU/EUP); result feeds a bf16 MXU op.
            hb = hn.astype(jnp.bfloat16) * gamma.astype(jnp.bfloat16) + beta.astype(jnp.bfloat16)
            a = hb * jax.nn.sigmoid(hb)
        else:
            # f32 elementwise (v5e has no bf16 VPU/EUP); exp + reciprocal both on the EUP slot.
            hf = hn * gamma + beta
            a = hf * pl.reciprocal(1.0 + jnp.exp(-hf), approx=True)

        x = a.astype(mxu_dtype)

    # Mean head: Linear with bias (output lane-padded to a multiple of 128).
    mean = jnp.dot(x, wm_ref[...], preferred_element_type=jnp.float32) + bm_ref[...]
    out_ref[...] = mean.astype(out_ref.dtype)


# ----------------------------------------------------------------------------- wrapper
def mlp_forward(x, layer_params, mean_w, mean_b, *, eps=1e-3, batch_tile=None,
                param_dtype=jnp.bfloat16):
    """Run the fused MLP forward.

    x:            (B, inp_dim) float32 (or bfloat16 if the producer already emits bf16)
    layer_params: list of (w (in, units), gamma (1, units) or (units,), beta likewise)
    mean_w:       (units, out_dim)
    mean_b:       (out_dim,) or (1, out_dim)
    returns mean: (B, out_dim) float32

    param_dtype:  dtype fed to the MXU for the weight matrices (bf16 fast path by default;
                  pass jnp.float32 for a bit-accurate f32 reference path).
    """
    B, inp_dim = x.shape
    num_layers = len(layer_params)
    units = layer_params[0][0].shape[1]
    out_dim = mean_w.shape[1]

    exact = jnp.dtype(param_dtype) == jnp.dtype(jnp.float32)
    gen = _tpu_generation()
    cores = _parallel_grid_cores(gen)
    ew_bf16 = (not exact) and (gen is not None and gen >= 6)   # bf16 VPU/EUP only on v6e/v7x
    out_dtype = jnp.float32 if exact else jnp.bfloat16         # fast path halves the padded writeback

    inp_pad = _round_up(inp_dim, 128)     # lane-dense K of the first matmul
    out_pad = _round_up(out_dim, 128)     # lane-dense output width (unmasked stores)

    if batch_tile is None:
        batch_tile = _pick_batch_tile(B, gen, cores)
    batch_tile = _round_up(batch_tile, 8)
    B_pad = _round_up(B, batch_tile)

    # Stream x in its native dtype (bf16 from the producer halves the x DMA); upcast oddballs.
    if x.dtype in (jnp.dtype(jnp.float32), jnp.dtype(jnp.bfloat16)):
        x_in = x
    else:
        x_in = x.astype(jnp.float32)
    pad_rows, pad_cols = B_pad - B, inp_pad - inp_dim
    if pad_rows or pad_cols:
        x_in = jnp.pad(x_in, ((0, pad_rows), (0, pad_cols)))

    # Parameters: weights in param_dtype (MXU), gamma/beta/bias in f32 (VPU).
    flat_params = []
    for li, (w, g, b) in enumerate(layer_params):
        w = jnp.asarray(w, jnp.float32)
        if li == 0 and pad_cols:
            w = jnp.pad(w, ((0, pad_cols), (0, 0)))            # zero rows for padded K
        flat_params.append(w.astype(param_dtype))
        flat_params.append(jnp.asarray(g, jnp.float32).reshape(1, -1))
        flat_params.append(jnp.asarray(b, jnp.float32).reshape(1, -1))
    wm = jnp.zeros((mean_w.shape[0], out_pad), param_dtype)
    wm = wm.at[:, :out_dim].set(jnp.asarray(mean_w, jnp.float32).astype(param_dtype))
    bm = jnp.zeros((1, out_pad), jnp.float32)
    bm = bm.at[:, :out_dim].set(jnp.asarray(mean_b, jnp.float32).reshape(1, -1))
    flat_params += [wm, bm]

    kernel = functools.partial(_mlp_kernel, num_layers, eps, exact, ew_bf16)
    grid = (B_pad // batch_tile,)

    # --- Cost estimate (helps XLA schedule around the custom call). ----------------------
    flops = 2 * B_pad * inp_pad * units
    d = units
    for (w, _, _) in layer_params[1:]:
        flops += 2 * B_pad * d * w.shape[1]
        d = w.shape[1]
    flops += 2 * B_pad * d * out_pad
    transcendentals = B_pad * num_layers * (units + 1)          # sigmoid exp + rsqrt per row/layer
    param_bytes = sum(int(p.size) * p.dtype.itemsize for p in flat_params)
    x_itemsize = jnp.dtype(x_in.dtype).itemsize
    out_itemsize = jnp.dtype(out_dtype).itemsize
    bytes_accessed = (B_pad * inp_pad * x_itemsize + param_bytes + B_pad * out_pad * out_itemsize)
    cost = pl.CostEstimate(flops=int(flops), transcendentals=int(transcendentals),
                           bytes_accessed=int(bytes_accessed))

    cap = _vmem_capacity_bytes(gen)

    def _build_and_call(param_buffers):
        def param_spec(arr):
            nd = arr.ndim
            idx = lambda i, _nd=nd: (0,) * _nd                  # constant block: resident, no re-DMA
            if param_buffers is None:
                return pl.BlockSpec(arr.shape, idx)
            return pl.BlockSpec(arr.shape, idx, pipeline_mode=pl.Buffered(param_buffers))

        in_specs = [pl.BlockSpec((batch_tile, inp_pad), lambda i: (i, 0))]
        in_specs += [param_spec(p) for p in flat_params]
        out_spec = pl.BlockSpec((batch_tile, out_pad), lambda i: (i, 0))

        # VMEM budget: streamed x/out tiles are double-buffered by the pipeline; resident
        # params are x1 when single-buffered (x2 otherwise); plus f32 working intermediates.
        act_bytes = 2 * batch_tile * (inp_pad * x_itemsize + out_pad * out_itemsize)
        p_bytes = param_bytes * (1 if param_buffers == 1 else 2)
        work_bytes = 6 * batch_tile * max(units, out_pad) * 4
        needed = act_bytes + p_bytes + work_bytes
        vmem_limit = int(min(int(0.75 * cap), max(needed + (8 << 20), 16 << 20)))

        fn = pl.pallas_call(
            kernel,
            out_shape=jax.ShapeDtypeStruct((B_pad, out_pad), out_dtype),
            grid_spec=pltpu.PrefetchScalarGridSpec(
                num_scalar_prefetch=0,
                grid=grid,
                in_specs=in_specs,
                out_specs=out_spec,
            ),
            compiler_params=pltpu.CompilerParams(
                dimension_semantics=("parallel",),
                vmem_limit_bytes=vmem_limit),
            cost_estimate=cost,
        )
        return fn(x_in, *flat_params)

    try:
        out = _build_and_call(1)        # single-buffer the resident params (VMEM hygiene)
    except Exception:
        out = _build_and_call(None)     # fallback: default pipeline buffering

    return out[:B, :out_dim].astype(jnp.float32)


# ----------------------------------------------------------------------------- reference
def mlp_reference(x, layer_params, mean_w, mean_b, eps=1e-3):
    h = x.astype(jnp.float32)
    for (w, g, b) in layer_params:
        h = h @ w.astype(jnp.float32)
        mu = jnp.mean(h, axis=-1, keepdims=True)
        var = jnp.mean((h - mu) ** 2, axis=-1, keepdims=True)
        h = (h - mu) / jnp.sqrt(var + eps) * g.reshape(1, -1) + b.reshape(1, -1)
        h = h * jax.nn.sigmoid(h)
    return h @ mean_w.astype(jnp.float32) + jnp.asarray(mean_b, jnp.float32).reshape(1, -1)


if __name__ == "__main__":
    # Module config (small, consistent with MLP(inp_dim, shape, layers, units, ...)):
    inp_dim = 32
    units = 128
    num_layers = 2
    out_dim = 8               # self._shape = (8,) -> mean head outputs prod(shape) = 8
    batch = 16

    key = jax.random.PRNGKey(0)
    keys = jax.random.split(key, 3 + num_layers)

    x = jax.random.normal(keys[0], (batch, inp_dim), dtype=jnp.float32)

    layer_params = []
    in_dim = inp_dim
    for li in range(num_layers):
        kw, kg, kb = jax.random.split(keys[1 + li], 3)
        w = jax.random.normal(kw, (in_dim, units), dtype=jnp.float32) * 0.05
        gamma = 1.0 + 0.1 * jax.random.normal(kg, (1, units), dtype=jnp.float32)
        beta = 0.1 * jax.random.normal(kb, (1, units), dtype=jnp.float32)
        layer_params.append((w, gamma, beta))
        in_dim = units

    mean_w = jax.random.normal(keys[-2], (units, out_dim), dtype=jnp.float32) * 0.05
    mean_b = 0.01 * jax.random.normal(keys[-1], (1, out_dim), dtype=jnp.float32)

    ref = mlp_reference(x, layer_params, mean_w, mean_b, eps=1e-3)

    # 1) f32 parameter path: strict structural check against the reference.
    mean_f32 = mlp_forward(x, layer_params, mean_w, mean_b, eps=1e-3,
                           param_dtype=jnp.float32)
    mean_f32 = jax.block_until_ready(mean_f32)
    assert mean_f32.shape == (batch, out_dim)
    assert jnp.allclose(mean_f32, ref, atol=1e-4, rtol=1e-4), "f32 path mismatch"

    # 2) Default fast path: bf16 weights on the MXU, f32 accumulation / LayerNorm reductions,
    #    bf16 elementwise + bf16 output on v6e/v7x.
    mean_fast = mlp_forward(x, layer_params, mean_w, mean_b, eps=1e-3)
    mean_fast = jax.block_until_ready(mean_fast)
    assert mean_fast.shape == (batch, out_dim)
    assert jnp.allclose(mean_fast, ref, atol=5e-2, rtol=5e-2), "bf16 fast path mismatch"

    # std for the Normal distribution is the constant self._std == 1.0 (no compute needed).
    print("KERNEL_OK")
</pallas_src>

<mosaic_0001>
module attributes {stable_mosaic.version = 11 : i64} {
  func.func @_mlp_kernel(%arg0: i32, %arg1: memref<16x128xf32, #tpu.memory_space<vmem>>, %arg2: memref<128x128xf32, #tpu.memory_space<vmem>>, %arg3: memref<1x128xf32, #tpu.memory_space<vmem>>, %arg4: memref<1x128xf32, #tpu.memory_space<vmem>>, %arg5: memref<128x128xf32, #tpu.memory_space<vmem>>, %arg6: memref<1x128xf32, #tpu.memory_space<vmem>>, %arg7: memref<1x128xf32, #tpu.memory_space<vmem>>, %arg8: memref<128x128xf32, #tpu.memory_space<vmem>>, %arg9: memref<1x128xf32, #tpu.memory_space<vmem>>, %arg10: memref<16x128xf32, #tpu.memory_space<vmem>>) attributes {dimension_semantics = [#tpu.dimension_semantics<parallel>], iteration_bounds = array<i64: 1>, scalar_prefetch = 0 : i64, scratch_operands = 0 : i64, tpu.core_type = #tpu.core_type<tc>, window_params = [{transform_indices = @transform_0, window_bounds = array<i64: 16, 128>}, {pipeline_mode = #tpu.pipeline_mode<synchronous>, transform_indices = @transform_1, window_bounds = array<i64: 128, 128>}, {pipeline_mode = #tpu.pipeline_mode<synchronous>, transform_indices = @transform_2, window_bounds = array<i64: 1, 128>}, {pipeline_mode = #tpu.pipeline_mode<synchronous>, transform_indices = @transform_3, window_bounds = array<i64: 1, 128>}, {pipeline_mode = #tpu.pipeline_mode<synchronous>, transform_indices = @transform_4, window_bounds = array<i64: 128, 128>}, {pipeline_mode = #tpu.pipeline_mode<synchronous>, transform_indices = @transform_5, window_bounds = array<i64: 1, 128>}, {pipeline_mode = #tpu.pipeline_mode<synchronous>, transform_indices = @transform_6, window_bounds = array<i64: 1, 128>}, {pipeline_mode = #tpu.pipeline_mode<synchronous>, transform_indices = @transform_7, window_bounds = array<i64: 128, 128>}, {pipeline_mode = #tpu.pipeline_mode<synchronous>, transform_indices = @transform_8, window_bounds = array<i64: 1, 128>}, {transform_indices = @transform_9, window_bounds = array<i64: 16, 128>}]} {
    %c0 = arith.constant 0 : index
    %c0_0 = arith.constant 0 : index
    %0 = vector.load %arg1[%c0, %c0_0] : memref<16x128xf32, #tpu.memory_space<vmem>>, vector<16x128xf32>
    %c0_1 = arith.constant 0 : index
    %c0_2 = arith.constant 0 : index
    %1 = vector.load %arg2[%c0_1, %c0_2] : memref<128x128xf32, #tpu.memory_space<vmem>>, vector<128x128xf32>
    %c0_3 = arith.constant 0 : index
    %c0_4 = arith.constant 0 : index
    %2 = vector.load %arg3[%c0_3, %c0_4] : memref<1x128xf32, #tpu.memory_space<vmem>>, vector<1x128xf32>
    %c0_5 = arith.constant 0 : index
    %c0_6 = arith.constant 0 : index
    %3 = vector.load %arg4[%c0_5, %c0_6] : memref<1x128xf32, #tpu.memory_space<vmem>>, vector<1x128xf32>
    %cst = arith.constant dense<0.000000e+00> : vector<16x128xf32>
    %4 = tpu.matmul %0, %1, %cst {dimension_numbers = #tpu.dot_dimension_numbers<[1], [0], [0], [1], [0, 0, 1, 1], [], []>} : vector<16x128xf32>, vector<128x128xf32>, vector<16x128xf32> -> vector<16x128xf32>
    %cst_7 = arith.constant dense<0.000000e+00> : vector<16xf32>
    %5 = vector.multi_reduction <add>, %4, %cst_7 [1] : vector<16x128xf32> to vector<16xf32>
    %6 = vector.shape_cast %5 : vector<16xf32> to vector<16x1xf32>
    %cst_8 = arith.constant 1.280000e+02 : f32
    %7 = vector.broadcast %cst_8 : f32 to vector<16x1xf32>
    %8 = arith.divf %6, %7 : vector<16x1xf32>
    %9 = vector.broadcast %8 : vector<16x1xf32> to vector<16x128xf32>
    %10 = arith.subf %4, %9 : vector<16x128xf32>
    %11 = arith.mulf %10, %10 : vector<16x128xf32>
    %cst_9 = arith.constant dense<0.000000e+00> : vector<16xf32>
    %12 = vector.multi_reduction <add>, %11, %cst_9 [1] : vector<16x128xf32> to vector<16xf32>
    %13 = vector.shape_cast %12 : vector<16xf32> to vector<16x1xf32>
    %cst_10 = arith.constant 1.280000e+02 : f32
    %14 = vector.broadcast %cst_10 : f32 to vector<16x1xf32>
    %15 = arith.divf %13, %14 : vector<16x1xf32>
    %16 = vector.broadcast %8 : vector<16x1xf32> to vector<16x128xf32>
    %17 = arith.subf %4, %16 : vector<16x128xf32>
    %cst_11 = arith.constant 1.000000e-03 : f32
    %18 = vector.broadcast %cst_11 : f32 to vector<16x1xf32>
    %19 = arith.addf %15, %18 : vector<16x1xf32>
    %20 = math.rsqrt %19 : vector<16x1xf32>
    %21 = vector.broadcast %20 : vector<16x1xf32> to vector<16x128xf32>
    %22 = arith.mulf %17, %21 : vector<16x128xf32>
    %23 = vector.broadcast %2 : vector<1x128xf32> to vector<16x128xf32>
    %24 = arith.mulf %22, %23 : vector<16x128xf32>
    %25 = vector.broadcast %3 : vector<1x128xf32> to vector<16x128xf32>
    %26 = arith.addf %24, %25 : vector<16x128xf32>
    %27 = arith.negf %26 : vector<16x128xf32>
    %28 = math.exp %27 : vector<16x128xf32>
    %cst_12 = arith.constant 1.000000e+00 : f32
    %29 = vector.broadcast %cst_12 : f32 to vector<16x128xf32>
    %30 = arith.addf %29, %28 : vector<16x128xf32>
    %31 = arith.divf %29, %30 : vector<16x128xf32>
    %32 = arith.mulf %26, %31 : vector<16x128xf32>
    %c0_13 = arith.constant 0 : index
    %c0_14 = arith.constant 0 : index
    %33 = vector.load %arg5[%c0_13, %c0_14] : memref<128x128xf32, #tpu.memory_space<vmem>>, vector<128x128xf32>
    %c0_15 = arith.constant 0 : index
    %c0_16 = arith.constant 0 : index
    %34 = vector.load %arg6[%c0_15, %c0_16] : memref<1x128xf32, #tpu.memory_space<vmem>>, vector<1x128xf32>
    %c0_17 = arith.constant 0 : index
    %c0_18 = arith.constant 0 : index
    %35 = vector.load %arg7[%c0_17, %c0_18] : memref<1x128xf32, #tpu.memory_space<vmem>>, vector<1x128xf32>
    %cst_19 = arith.constant dense<0.000000e+00> : vector<16x128xf32>
    %36 = tpu.matmul %32, %33, %cst_19 {dimension_numbers = #tpu.dot_dimension_numbers<[1], [0], [0], [1], [0, 0, 1, 1], [], []>} : vector<16x128xf32>, vector<128x128xf32>, vector<16x128xf32> -> vector<16x128xf32>
    %cst_20 = arith.constant dense<0.000000e+00> : vector<16xf32>
    %37 = vector.multi_reduction <add>, %36, %cst_20 [1] : vector<16x128xf32> to vector<16xf32>
    %38 = vector.shape_cast %37 : vector<16xf32> to vector<16x1xf32>
    %cst_21 = arith.constant 1.280000e+02 : f32
    %39 = vector.broadcast %cst_21 : f32 to vector<16x1xf32>
    %40 = arith.divf %38, %39 : vector<16x1xf32>
    %41 = vector.broadcast %40 : vector<16x1xf32> to vector<16x128xf32>
    %42 = arith.subf %36, %41 : vector<16x128xf32>
    %43 = arith.mulf %42, %42 : vector<16x128xf32>
    %cst_22 = arith.constant dense<0.000000e+00> : vector<16xf32>
    %44 = vector.multi_reduction <add>, %43, %cst_22 [1] : vector<16x128xf32> to vector<16xf32>
    %45 = vector.shape_cast %44 : vector<16xf32> to vector<16x1xf32>
    %cst_23 = arith.constant 1.280000e+02 : f32
    %46 = vector.broadcast %cst_23 : f32 to vector<16x1xf32>
    %47 = arith.divf %45, %46 : vector<16x1xf32>
    %48 = vector.broadcast %40 : vector<16x1xf32> to vector<16x128xf32>
    %49 = arith.subf %36, %48 : vector<16x128xf32>
    %cst_24 = arith.constant 1.000000e-03 : f32
    %50 = vector.broadcast %cst_24 : f32 to vector<16x1xf32>
    %51 = arith.addf %47, %50 : vector<16x1xf32>
    %52 = math.rsqrt %51 : vector<16x1xf32>
    %53 = vector.broadcast %52 : vector<16x1xf32> to vector<16x128xf32>
    %54 = arith.mulf %49, %53 : vector<16x128xf32>
    %55 = vector.broadcast %34 : vector<1x128xf32> to vector<16x128xf32>
    %56 = arith.mulf %54, %55 : vector<16x128xf32>
    %57 = vector.broadcast %35 : vector<1x128xf32> to vector<16x128xf32>
    %58 = arith.addf %56, %57 : vector<16x128xf32>
    %59 = arith.negf %58 : vector<16x128xf32>
    %60 = math.exp %59 : vector<16x128xf32>
    %cst_25 = arith.constant 1.000000e+00 : f32
    %61 = vector.broadcast %cst_25 : f32 to vector<16x128xf32>
    %62 = arith.addf %61, %60 : vector<16x128xf32>
    %63 = arith.divf %61, %62 : vector<16x128xf32>
    %64 = arith.mulf %58, %63 : vector<16x128xf32>
    %c0_26 = arith.constant 0 : index
    %c0_27 = arith.constant 0 : index
    %65 = vector.load %arg8[%c0_26, %c0_27] : memref<128x128xf32, #tpu.memory_space<vmem>>, vector<128x128xf32>
    %cst_28 = arith.constant dense<0.000000e+00> : vector<16x128xf32>
    %66 = tpu.matmul %64, %65, %cst_28 {dimension_numbers = #tpu.dot_dimension_numbers<[1], [0], [0], [1], [0, 0, 1, 1], [], []>} : vector<16x128xf32>, vector<128x128xf32>, vector<16x128xf32> -> vector<16x128xf32>
    %c0_29 = arith.constant 0 : index
    %c0_30 = arith.constant 0 : index
    %67 = vector.load %arg9[%c0_29, %c0_30] : memref<1x128xf32, #tpu.memory_space<vmem>>, vector<1x128xf32>
    %68 = vector.broadcast %67 : vector<1x128xf32> to vector<16x128xf32>
    %69 = arith.addf %66, %68 : vector<16x128xf32>
    %c0_31 = arith.constant 0 : index
    %c0_32 = arith.constant 0 : index
    %70 = vector.load %arg10[%c0_31, %c0_32] : memref<16x128xf32, #tpu.memory_space<vmem>>, vector<16x128xf32>
    tpu.vector_store %arg10[%c0_31, %c0_32], %69 {strides = array<i32>} : memref<16x128xf32, #tpu.memory_space<vmem>>, vector<16x128xf32>,
    return
  }
  func.func @transform_0(%arg0: i32) -> (i32, i32) {
    %c0_i32 = arith.constant 0 : i32
    %c0_i32_0 = arith.constant 0 : i32
    return %arg0, %c0_i32 : i32, i32
  }
  func.func @transform_1(%arg0: i32) -> (i32, i32) {
    %c0_i32 = arith.constant 0 : i32
    %c0_i32_0 = arith.constant 0 : i32
    %c0_i32_1 = arith.constant 0 : i32
    return %c0_i32, %c0_i32_0 : i32, i32
  }
  func.func @transform_2(%arg0: i32) -> (i32, i32) {
    %c0_i32 = arith.constant 0 : i32
    %c0_i32_0 = arith.constant 0 : i32
    %c0_i32_1 = arith.constant 0 : i32
    return %c0_i32, %c0_i32_0 : i32, i32
  }
  func.func @transform_3(%arg0: i32) -> (i32, i32) {
    %c0_i32 = arith.constant 0 : i32
    %c0_i32_0 = arith.constant 0 : i32
    %c0_i32_1 = arith.constant 0 : i32
    return %c0_i32, %c0_i32_0 : i32, i32
  }
  func.func @transform_4(%arg0: i32) -> (i32, i32) {
    %c0_i32 = arith.constant 0 : i32
    %c0_i32_0 = arith.constant 0 : i32
    %c0_i32_1 = arith.constant 0 : i32
    return %c0_i32, %c0_i32_0 : i32, i32
  }
  func.func @transform_5(%arg0: i32) -> (i32, i32) {
    %c0_i32 = arith.constant 0 : i32
    %c0_i32_0 = arith.constant 0 : i32
    %c0_i32_1 = arith.constant 0 : i32
    return %c0_i32, %c0_i32_0 : i32, i32
  }
  func.func @transform_6(%arg0: i32) -> (i32, i32) {
    %c0_i32 = arith.constant 0 : i32
    %c0_i32_0 = arith.constant 0 : i32
    %c0_i32_1 = arith.constant 0 : i32
    return %c0_i32, %c0_i32_0 : i32, i32
  }
  func.func @transform_7(%arg0: i32) -> (i32, i32) {
    %c0_i32 = arith.constant 0 : i32
    %c0_i32_0 = arith.constant 0 : i32
    %c0_i32_1 = arith.constant 0 : i32
    return %c0_i32, %c0_i32_0 : i32, i32
  }
  func.func @transform_8(%arg0: i32) -> (i32, i32) {
    %c0_i32 = arith.constant 0 : i32
    %c0_i32_0 = arith.constant 0 : i32
    %c0_i32_1 = arith.constant 0 : i32
    return %c0_i32, %c0_i32_0 : i32, i32
  }
  func.func @transform_9(%arg0: i32) -> (i32, i32) {
    %c0_i32 = arith.constant 0 : i32
    %c0_i32_0 = arith.constant 0 : i32
    return %arg0, %c0_i32 : i32, i32
  }
}

module attributes {stable_mosaic.version = 11 : i64} {
  func.func @_mlp_kernel(%arg0: i32, %arg1: memref<16x128xf32, #tpu.memory_space<vmem>>, %arg2: memref<128x128xf32, #tpu.memory_space<vmem>>, %arg3: memref<1x128xf32, #tpu.memory_space<vmem>>, %arg4: memref<1x128xf32, #tpu.memory_space<vmem>>, %arg5: memref<128x128xf32, #tpu.memory_space<vmem>>, %arg6: memref<1x128xf32, #tpu.memory_space<vmem>>, %arg7: memref<1x128xf32, #tpu.memory_space<vmem>>, %arg8: memref<128x128xf32, #tpu.memory_space<vmem>>, %arg9: memref<1x128xf32, #tpu.memory_space<vmem>>, %arg10: memref<16x128xf32, #tpu.memory_space<vmem>>) attributes {dimension_semantics = [#tpu.dimension_semantics<parallel>], iteration_bounds = array<i64: 1>, scalar_prefetch = 0 : i64, scratch_operands = 0 : i64, tpu.core_type = #tpu.core_type<tc>, window_params = [{transform_indices = @transform_0, window_bounds = array<i64: 16, 128>}, {pipeline_mode = #tpu.pipeline_mode<synchronous>, transform_indices = @transform_1, window_bounds = array<i64: 128, 128>}, {pipeline_mode = #tpu.pipeline_mode<synchronous>, transform_indices = @transform_2, window_bounds = array<i64: 1, 128>}, {pipeline_mode = #tpu.pipeline_mode<synchronous>, transform_indices = @transform_3, window_bounds = array<i64: 1, 128>}, {pipeline_mode = #tpu.pipeline_mode<synchronous>, transform_indices = @transform_4, window_bounds = array<i64: 128, 128>}, {pipeline_mode = #tpu.pipeline_mode<synchronous>, transform_indices = @transform_5, window_bounds = array<i64: 1, 128>}, {pipeline_mode = #tpu.pipeline_mode<synchronous>, transform_indices = @transform_6, window_bounds = array<i64: 1, 128>}, {pipeline_mode = #tpu.pipeline_mode<synchronous>, transform_indices = @transform_7, window_bounds = array<i64: 128, 128>}, {pipeline_mode = #tpu.pipeline_mode<synchronous>, transform_indices = @transform_8, window_bounds = array<i64: 1, 128>}, {transform_indices = @transform_9, window_bounds = array<i64: 16, 128>}]} {
    %c0 = arith.constant 0 : index
    %c0_0 = arith.constant 0 : index
    %0 = vector.load %arg1[%c0, %c0_0] : memref<16x128xf32, #tpu.memory_space<vmem>>, vector<16x128xf32>
    %c0_1 = arith.constant 0 : index
    %c0_2 = arith.constant 0 : index
    %1 = vector.load %arg2[%c0_1, %c0_2] : memref<128x128xf32, #tpu.memory_space<vmem>>, vector<128x128xf32>
    %c0_3 = arith.constant 0 : index
    %c0_4 = arith.constant 0 : index
    %2 = vector.load %arg3[%c0_3, %c0_4] : memref<1x128xf32, #tpu.memory_space<vmem>>, vector<1x128xf32>
    %c0_5 = arith.constant 0 : index
    %c0_6 = arith.constant 0 : index
    %3 = vector.load %arg4[%c0_5, %c0_6] : memref<1x128xf32, #tpu.memory_space<vmem>>, vector<1x128xf32>
    %cst = arith.constant dense<0.000000e+00> : vector<16x128xf32>
    %4 = tpu.matmul %0, %1, %cst {dimension_numbers = #tpu.dot_dimension_numbers<[1], [0], [0], [1], [0, 0, 1, 1], [], []>} : vector<16x128xf32>, vector<128x128xf32>, vector<16x128xf32> -> vector<16x128xf32>
    %cst_7 = arith.constant dense<0.000000e+00> : vector<16xf32>
    %5 = vector.multi_reduction <add>, %4, %cst_7 [1] : vector<16x128xf32> to vector<16xf32>
    %6 = vector.shape_cast %5 : vector<16xf32> to vector<16x1xf32>
    %cst_8 = arith.constant 1.280000e+02 : f32
    %7 = vector.broadcast %cst_8 : f32 to vector<16x1xf32>
    %8 = arith.divf %6, %7 : vector<16x1xf32>
    %9 = vector.broadcast %8 : vector<16x1xf32> to vector<16x128xf32>
    %10 = arith.subf %4, %9 : vector<16x128xf32>
    %11 = arith.mulf %10, %10 : vector<16x128xf32>
    %cst_9 = arith.constant dense<0.000000e+00> : vector<16xf32>
    %12 = vector.multi_reduction <add>, %11, %cst_9 [1] : vector<16x128xf32> to vector<16xf32>
    %13 = vector.shape_cast %12 : vector<16xf32> to vector<16x1xf32>
    %cst_10 = arith.constant 1.280000e+02 : f32
    %14 = vector.broadcast %cst_10 : f32 to vector<16x1xf32>
    %15 = arith.divf %13, %14 : vector<16x1xf32>
    %16 = vector.broadcast %8 : vector<16x1xf32> to vector<16x128xf32>
    %17 = arith.subf %4, %16 : vector<16x128xf32>
    %cst_11 = arith.constant 1.000000e-03 : f32
    %18 = vector.broadcast %cst_11 : f32 to vector<16x1xf32>
    %19 = arith.addf %15, %18 : vector<16x1xf32>
    %20 = math.rsqrt %19 : vector<16x1xf32>
    %21 = vector.broadcast %20 : vector<16x1xf32> to vector<16x128xf32>
    %22 = arith.mulf %17, %21 : vector<16x128xf32>
    %23 = vector.broadcast %2 : vector<1x128xf32> to vector<16x128xf32>
    %24 = arith.mulf %22, %23 : vector<16x128xf32>
    %25 = vector.broadcast %3 : vector<1x128xf32> to vector<16x128xf32>
    %26 = arith.addf %24, %25 : vector<16x128xf32>
    %27 = arith.negf %26 : vector<16x128xf32>
    %28 = math.exp %27 : vector<16x128xf32>
    %cst_12 = arith.constant 1.000000e+00 : f32
    %29 = vector.broadcast %cst_12 : f32 to vector<16x128xf32>
    %30 = arith.addf %29, %28 : vector<16x128xf32>
    %31 = arith.divf %29, %30 : vector<16x128xf32>
    %32 = arith.mulf %26, %31 : vector<16x128xf32>
    %c0_13 = arith.constant 0 : index
    %c0_14 = arith.constant 0 : index
    %33 = vector.load %arg5[%c0_13, %c0_14] : memref<128x128xf32, #tpu.memory_space<vmem>>, vector<128x128xf32>
    %c0_15 = arith.constant 0 : index
    %c0_16 = arith.constant 0 : index
    %34 = vector.load %arg6[%c0_15, %c0_16] : memref<1x128xf32, #tpu.memory_space<vmem>>, vector<1x128xf32>
    %c0_17 = arith.constant 0 : index
    %c0_18 = arith.constant 0 : index
    %35 = vector.load %arg7[%c0_17, %c0_18] : memref<1x128xf32, #tpu.memory_space<vmem>>, vector<1x128xf32>
    %cst_19 = arith.constant dense<0.000000e+00> : vector<16x128xf32>
    %36 = tpu.matmul %32, %33, %cst_19 {dimension_numbers = #tpu.dot_dimension_numbers<[1], [0], [0], [1], [0, 0, 1, 1], [], []>} : vector<16x128xf32>, vector<128x128xf32>, vector<16x128xf32> -> vector<16x128xf32>
    %cst_20 = arith.constant dense<0.000000e+00> : vector<16xf32>
    %37 = vector.multi_reduction <add>, %36, %cst_20 [1] : vector<16x128xf32> to vector<16xf32>
    %38 = vector.shape_cast %37 : vector<16xf32> to vector<16x1xf32>
    %cst_21 = arith.constant 1.280000e+02 : f32
    %39 = vector.broadcast %cst_21 : f32 to vector<16x1xf32>
    %40 = arith.divf %38, %39 : vector<16x1xf32>
    %41 = vector.broadcast %40 : vector<16x1xf32> to vector<16x128xf32>
    %42 = arith.subf %36, %41 : vector<16x128xf32>
    %43 = arith.mulf %42, %42 : vector<16x128xf32>
    %cst_22 = arith.constant dense<0.000000e+00> : vector<16xf32>
    %44 = vector.multi_reduction <add>, %43, %cst_22 [1] : vector<16x128xf32> to vector<16xf32>
    %45 = vector.shape_cast %44 : vector<16xf32> to vector<16x1xf32>
    %cst_23 = arith.constant 1.280000e+02 : f32
    %46 = vector.broadcast %cst_23 : f32 to vector<16x1xf32>
    %47 = arith.divf %45, %46 : vector<16x1xf32>
    %48 = vector.broadcast %40 : vector<16x1xf32> to vector<16x128xf32>
    %49 = arith.subf %36, %48 : vector<16x128xf32>
    %cst_24 = arith.constant 1.000000e-03 : f32
    %50 = vector.broadcast %cst_24 : f32 to vector<16x1xf32>
    %51 = arith.addf %47, %50 : vector<16x1xf32>
    %52 = math.rsqrt %51 : vector<16x1xf32>
    %53 = vector.broadcast %52 : vector<16x1xf32> to vector<16x128xf32>
    %54 = arith.mulf %49, %53 : vector<16x128xf32>
    %55 = vector.broadcast %34 : vector<1x128xf32> to vector<16x128xf32>
    %56 = arith.mulf %54, %55 : vector<16x128xf32>
    %57 = vector.broadcast %35 : vector<1x128xf32> to vector<16x128xf32>
    %58 = arith.addf %56, %57 : vector<16x128xf32>
    %59 = arith.negf %58 : vector<16x128xf32>
    %60 = math.exp %59 : vector<16x128xf32>
    %cst_25 = arith.constant 1.000000e+00 : f32
    %61 = vector.broadcast %cst_25 : f32 to vector<16x128xf32>
    %62 = arith.addf %61, %60 : vector<16x128xf32>
    %63 = arith.divf %61, %62 : vector<16x128xf32>
    %64 = arith.mulf %58, %63 : vector<16x128xf32>
    %c0_26 = arith.constant 0 : index
    %c0_27 = arith.constant 0 : index
    %65 = vector.load %arg8[%c0_26, %c0_27] : memref<128x128xf32, #tpu.memory_space<vmem>>, vector<128x128xf32>
    %cst_28 = arith.constant dense<0.000000e+00> : vector<16x128xf32>
    %66 = tpu.matmul %64, %65, %cst_28 {dimension_numbers = #tpu.dot_dimension_numbers<[1], [0], [0], [1], [0, 0, 1, 1], [], []>} : vector<16x128xf32>, vector<128x128xf32>, vector<16x128xf32> -> vector<16x128xf32>
    %c0_29 = arith.constant 0 : index
    %c0_30 = arith.constant 0 : index
    %67 = vector.load %arg9[%c0_29, %c0_30] : memref<1x128xf32, #tpu.memory_space<vmem>>, vector<1x128xf32>
    %68 = vector.broadcast %67 : vector<1x128xf32> to vector<16x128xf32>
    %69 = arith.addf %66, %68 : vector<16x128xf32>
    %c0_31 = arith.constant 0 : index
    %c0_32 = arith.constant 0 : index
    %70 = vector.load %arg10[%c0_31, %c0_32] : memref<16x128xf32, #tpu.memory_space<vmem>>, vector<16x128xf32>
    tpu.vector_store %arg10[%c0_31, %c0_32], %69 {strides = array<i32>} : memref<16x128xf32, #tpu.memory_space<vmem>>, vector<16x128xf32>,
    return
  }
  func.func @transform_0(%arg0: i32) -> (i32, i32) {
    %c0_i32 = arith.constant 0 : i32
    %c0_i32_0 = arith.constant 0 : i32
    return %arg0, %c0_i32 : i32, i32
  }
  func.func @transform_1(%arg0: i32) -> (i32, i32) {
    %c0_i32 = arith.constant 0 : i32
    %c0_i32_0 = arith.constant 0 : i32
    %c0_i32_1 = arith.constant 0 : i32
    return %c0_i32, %c0_i32_0 : i32, i32
  }
  func.func @transform_2(%arg0: i32) -> (i32, i32) {
    %c0_i32 = arith.constant 0 : i32
    %c0_i32_0 = arith.constant 0 : i32
    %c0_i32_1 = arith.constant 0 : i32
    return %c0_i32, %c0_i32_0 : i32, i32
  }
  func.func @transform_3(%arg0: i32) -> (i32, i32) {
    %c0_i32 = arith.constant 0 : i32
    %c0_i32_0 = arith.constant 0 : i32
    %c0_i32_1 = arith.constant 0 : i32
    return %c0_i32, %c0_i32_0 : i32, i32
  }
  func.func @transform_4(%arg0: i32) -> (i32, i32) {
    %c0_i32 = arith.constant 0 : i32
    %c0_i32_0 = arith.constant 0 : i32
    %c0_i32_1 = arith.constant 0 : i32
    return %c0_i32, %c0_i32_0 : i32, i32
  }
  func.func @transform_5(%arg0: i32) -> (i32, i32) {
    %c0_i32 = arith.constant 0 : i32
    %c0_i32_0 = arith.constant 0 : i32
    %c0_i32_1 = arith.constant 0 : i32
    return %c0_i32, %c0_i32_0 : i32, i32
  }
  func.func @transform_6(%arg0: i32) -> (i32, i32) {
    %c0_i32 = arith.constant 0 : i32
    %c0_i32_0 = arith.constant 0 : i32
    %c0_i32_1 = arith.constant 0 : i32
    return %c0_i32, %c0_i32_0 : i32, i32
  }
  func.func @transform_7(%arg0: i32) -> (i32, i32) {
    %c0_i32 = arith.constant 0 : i32
    %c0_i32_0 = arith.constant 0 : i32
    %c0_i32_1 = arith.constant 0 : i32
    return %c0_i32, %c0_i32_0 : i32, i32
  }
  func.func @transform_8(%arg0: i32) -> (i32, i32) {
    %c0_i32 = arith.constant 0 : i32
    %c0_i32_0 = arith.constant 0 : i32
    %c0_i32_1 = arith.constant 0 : i32
    return %c0_i32, %c0_i32_0 : i32, i32
  }
  func.func @transform_9(%arg0: i32) -> (i32, i32) {
    %c0_i32 = arith.constant 0 : i32
    %c0_i32_0 = arith.constant 0 : i32
    return %arg0, %c0_i32 : i32, i32
  }
}

</mosaic_0001>

<bundles_post_ra>
// kernel: tpu_custom_call.1
= control target key start
LH: loop header
LB: loop body
LE: loop exit
PB: predicated region body
PF: predicated region fallthrough
CT: control target
= control target key end

     0   :  { %14 = vsyncpa [#allocation3], 0  ;;  %s1074_s0 = inlined_call_operand.hbm [shape: f32[16,128], index: 0, kind: input, shape index: {}]   ;;  %s1075_s1 = inlined_call_operand.hbm [shape: f32[128,128], index: 1, kind: input, shape index: {}]   ;;  %s1076_s2 = inlined_call_operand.vmem [shape: f32[1,128], index: 2, kind: input, shape index: {}]   ;;  %s1077_s3 = inlined_call_operand.vmem [shape: f32[1,128], index: 3, kind: input, shape index: {}]   ;;  %s1078_s4 = inlined_call_operand.hbm [shape: f32[128,128], index: 4, kind: input, shape index: {}]   ;;  %s1079_s5 = inlined_call_operand.vmem [shape: f32[1,128], index: 5, kind: input, shape index: {}]   ;;  %s1080_s6 = inlined_call_operand.vmem [shape: f32[1,128], index: 6, kind: input, shape index: {}]   ;;  %s1081_s7 = inlined_call_operand.hbm [shape: f32[128,128], index: 7, kind: input, shape index: {}]   ;;  %s1082_s8 = inlined_call_operand.vmem [shape: f32[1,128], index: 8, kind: input, shape index: {}]   ;;  %s1083_s9 = inlined_call_operand.hbm [shape: f32[16,128], index: 9, kind: output, shape index: {}]  }
   0x1   :  { %15 = vsyncpa [#allocation6], 0 }
   0x2   :  { %16 = vsyncpa [#allocation9], 0 }
   0x3   :  { %17 = vsyncpa [#allocation4], 0  ;;  %s913_s30 = smov [#allocation5]   ;;  %s914_s11 = smov [#allocation2]  }
   0x4   :  { %s35_s10 = sshll.u32 %s913_s30, 4  ;;  %s23_s12 = sshll.u32 %s914_s11, 4  ;;  %s36_s10 = int_to_ptr.vmem [resolvable:$true] %s35_s10  ;;  %s970_s12 = int_to_ptr.vmem [resolvable:$true] %s23_s12 }
   0x5   :  { %s795_s15 = scalar_lea.hbm %s1075_s1, 2048 }
   0x6   :  { %p796_p0 = scmp.ne.s32.totalorder %s1075_s1, %s795_s15  ;;  %p799_p1 = scmp.lt.u32.totalorder %s795_s15, %s1075_s1 }
   0x8   :  { %p801_p2 = pnand %p799_p1, %p796_p0 }
   0xa   :  { %804 = shalt.err (!%p801_p2)
}
   0xb   :  { %s805_s20 = scalar_lea.vmem %s36_s10, 2048  ;;  %p810_p4 = scmp.lt.s32.totalorder %s36_s10, %s36_s10 }
   0xc   :  { %p806_p3 = scmp.ne.s32.totalorder %s36_s10, %s805_s20  ;;  %p811_p5 = scmp.lt.s32.totalorder %s805_s20, %s805_s20 }
   0xe   :  { %p812_p6 = por %p811_p5, %p810_p4 }
  0x10   :  { %p813_p7 = pnand %p812_p6, %p806_p3 }
  0x12   :  { %816 = shalt.err (!%p813_p7)
}
  0x13   :  { %s915_s21 = smov 128   ;;  %s916_s22 = smov 8  }
  0x14   :  { %41 = dma.hbm_to_vmem [thread:$0]  %s1075_s1, 2048, %s36_s10, [#allocation6], %s915_s21, %s915_s21, %s916_s22  }
  0x15   :  { %s817_s27 = scalar_lea.hbm %s1074_s0, 256 }
  0x16   :  { %p818_p8 = scmp.ne.s32.totalorder %s1074_s0, %s817_s27  ;;  %p821_p9 = scmp.lt.u32.totalorder %s817_s27, %s1074_s0 }
  0x18   :  { %p823_p10 = pnand %p821_p9, %p818_p8 }
  0x1a   :  { %826 = shalt.err (!%p823_p10)
}
  0x1b   :  { %s827_s13 = scalar_lea.vmem %s970_s12, 256  ;;  %p832_p12 = scmp.lt.s32.totalorder %s970_s12, %s970_s12 }
  0x1c   :  { %p828_p11 = scmp.ne.s32.totalorder %s970_s12, %s827_s13  ;;  %p833_p13 = scmp.lt.s32.totalorder %s827_s13, %s827_s13 }
  0x1e   :  { %p834_p0 = por %p833_p13, %p832_p12 }
  0x20   :  { %p835_p1 = pnand %p834_p0, %p828_p11 }
  0x22   :  { %838 = shalt.err (!%p835_p1)
}
  0x23   :  { %29 = dma.hbm_to_vmem [thread:$0]  %s1074_s0, 256, %s970_s12, [#allocation3], %s915_s21, %s915_s21, %s916_s22  }
  0x24   :  { %s917_s14 = smov [#allocation7]   ;;  %s918_s16 = smov [#allocation8]  }
  0x25   :  { %s51_s15 = sshll.u32 %s917_s14, 4  ;;  %s67_s17 = sshll.u32 %s918_s16, 4  ;;  %s52_s15 = int_to_ptr.vmem [resolvable:$true] %s51_s15  ;;  %s1007_s17 = int_to_ptr.vmem [resolvable:$true] %s67_s17 }
  0x26   :  { %s839_s20 = scalar_lea.hbm %s1078_s4, 2048 }
  0x27   :  { %p840_p2 = scmp.ne.s32.totalorder %s1078_s4, %s839_s20  ;;  %p843_p3 = scmp.lt.u32.totalorder %s839_s20, %s1078_s4 }
  0x29   :  { %p845_p4 = pnand %p843_p3, %p840_p2 }
  0x2b   :  { %848 = shalt.err (!%p845_p4)
}
  0x2c   :  { %s849_s0 = scalar_lea.vmem %s52_s15, 2048  ;;  %p854_p6 = scmp.lt.s32.totalorder %s52_s15, %s52_s15 }
  0x2d   :  { %p850_p5 = scmp.ne.s32.totalorder %s52_s15, %s849_s0  ;;  %p855_p7 = scmp.lt.s32.totalorder %s849_s0, %s849_s0 }
  0x2f   :  { %p856_p8 = por %p855_p7, %p854_p6 }
  0x31   :  { %p857_p9 = pnand %p856_p8, %p850_p5 }
  0x33   :  { %860 = shalt.err (!%p857_p9)
}
  0x34   :  { %57 = dma.hbm_to_vmem [thread:$0]  %s1078_s4, 2048, %s52_s15, [#allocation6], %s915_s21, %s915_s21, %s916_s22  }
  0x35   :  { %s861_s30 = scalar_lea.hbm %s1081_s7, 2048 }
  0x36   :  { %p862_p10 = scmp.ne.s32.totalorder %s1081_s7, %s861_s30  ;;  %p865_p11 = scmp.lt.u32.totalorder %s861_s30, %s1081_s7 }
  0x38   :  { %p867_p12 = pnand %p865_p11, %p862_p10 }
  0x3a   :  { %870 = shalt.err (!%p867_p12)
}
  0x3b   :  { %s871_s14 = scalar_lea.vmem %s1007_s17, 2048  ;;  %p876_p0 = scmp.lt.s32.totalorder %s1007_s17, %s1007_s17 }
  0x3c   :  { %p872_p13 = scmp.ne.s32.totalorder %s1007_s17, %s871_s14  ;;  %p877_p1 = scmp.lt.s32.totalorder %s871_s14, %s871_s14 }
  0x3e   :  { %p878_p2 = por %p877_p1, %p876_p0 }
  0x40   :  { %p879_p3 = pnand %p878_p2, %p872_p13 }
  0x42   :  { %882 = shalt.err (!%p879_p3)
}
  0x43   :  { %73 = dma.hbm_to_vmem [thread:$0]  %s1081_s7, 2048, %s1007_s17, [#allocation9], %s915_s21, %s915_s21, %s916_s22  }
  0x44   :  { %905 = dma.done.wait [#allocation3], 256  }
  0x45   :  { %906 = vsyncadd [#allocation3], 4294967040 }
  0x46   :  { %907 = dma.done.wait [#allocation6], 4096  }
  0x47   :  { %908 = vsyncadd [#allocation6], 4294963200 }
  0x48   :  { %909 = dma.done.wait [#allocation9], 2048  }
  0x49   :  { %910 = vsyncadd [#allocation9], 4294965248  ;;  %v90_v0 = vld [vmem:[#allocation5] sm:$0xff]  ;;  %v91_v1 = vld [vmem:[#allocation5 + $0x8] sm:$0xff]  ;;  %s919_s23 = smov [#allocation10]  }
  0x4a   :  { %v92_v2 = vld [vmem:[#allocation5 + $0x10] sm:$0xff]  ;;  %v668_v3 = vpack.c.bf16 %v91_v1, %v90_v0  ;;  %v93_v4 = vld [vmem:[#allocation5 + $0x18] sm:$0xff]  ;;  %v94_v6 = vld [vmem:[#allocation5 + $0x20] sm:$0xff]  ;;  %s486_s24 = sshll.u32 %s919_s23, 4  ;;  %s487_s24 = int_to_ptr.vmem [resolvable:$true] %s486_s24 }
  0x4b   :  { %v672_v5 = vpack.c.bf16 %v93_v4, %v92_v2  ;;  %v95_v7 = vld [vmem:[#allocation5 + $0x28] sm:$0xff]  ;;  %v88_v9 = vld [vmem:[#allocation2] sm:$0xff]  ;;  %v97_v11 = vld [vmem:[#allocation5 + $0x38] sm:$0xff]  ;;  %s883_s25 = scalar_lea.vmem %s487_s24, 256  ;;  %p888_p5 = scmp.lt.s32.totalorder %s487_s24, %s487_s24 }
  0x4c   :  { %669 = vmatprep.subr.bf16.mxu0 %v668_v3  ;;  %v676_v8 = vpack.c.bf16 %v95_v7, %v94_v6  ;;  %v96_v10 = vld [vmem:[#allocation5 + $0x30] sm:$0xff]  ;;  %595 = vmatprep.mubr.f32.mxu0 %v88_v9  ;;  %v98_v13 = vld [vmem:[#allocation5 + $0x40] sm:$0xff]  ;;  %v99_v14 = vld [vmem:[#allocation5 + $0x48] sm:$0xff]  ;;  %p884_p4 = scmp.ne.s32.totalorder %s487_s24, %s883_s25  ;;  %p889_p6 = scmp.lt.s32.totalorder %s883_s25, %s883_s25 }
  0x4d   :  { %671 = vmatpush3.bf16.msra.mxu0 %v668_v3  ;;  %v680_v12 = vpack.c.bf16 %v97_v11, %v96_v10  ;;  %v684_v15 = vpack.c.bf16 %v99_v14, %v98_v13  ;;  %v100_v16 = vld [vmem:[#allocation5 + $0x50] sm:$0xff]  ;;  %v101_v17 = vld [vmem:[#allocation5 + $0x58] sm:$0xff]  ;;  %v102_v19 = vld [vmem:[#allocation5 + $0x60] sm:$0xff] }
  0x4e   :  { %673 = vmatprep.subr.bf16.mxu0 %v672_v5  ;;  %v688_v18 = vpack.c.bf16 %v101_v17, %v100_v16  ;;  %v103_v20 = vld [vmem:[#allocation5 + $0x68] sm:$0xff]  ;;  %v104_v22 = vld [vmem:[#allocation5 + $0x70] sm:$0xff]  ;;  %v105_v23 = vld [vmem:[#allocation5 + $0x78] sm:$0xff]  ;;  %p890_p7 = por %p889_p6, %p888_p5 }
  0x4f   :  { %v692_v21 = vpack.c.bf16 %v103_v20, %v102_v19  ;;  %v696_v24 = vpack.c.bf16 %v105_v23, %v104_v22  ;;  %v89_v25 = vld [vmem:[#allocation2 + $0x8] sm:$0xff]  ;;  %v236_v36 = vld [vmem:[#allocation7] sm:$0xff]  ;;  %v237_v37 = vld [vmem:[#allocation7 + $0x8] sm:$0xff] }
  0x50   :  { %v238_v38 = vld [vmem:[#allocation7 + $0x10] sm:$0xff]  ;;  %v700_v39 = vpack.c.bf16 %v237_v37, %v236_v36  ;;  %v239_v40 = vld [vmem:[#allocation7 + $0x18] sm:$0xff]  ;;  %v240_v42 = vld [vmem:[#allocation7 + $0x20] sm:$0xff]  ;;  %p891_p8 = pnand %p890_p7, %p884_p4 }
  0x51   :  { %675 = vmatpush3.bf16.msra.mxu0 %v672_v5  ;;  %v704_v41 = vpack.c.bf16 %v239_v40, %v238_v38  ;;  %v241_v43 = vld [vmem:[#allocation7 + $0x28] sm:$0xff]  ;;  %v242_v45 = vld [vmem:[#allocation7 + $0x30] sm:$0xff]  ;;  %v243_v46 = vld [vmem:[#allocation7 + $0x38] sm:$0xff] }
  0x52   :  { %677 = vmatprep.subr.bf16.mxu0 %v676_v8  ;;  %701 = vmatprep.subr.bf16.mxu1 %v700_v39  ;;  %v708_v44 = vpack.c.bf16 %v241_v43, %v240_v42  ;;  %v712_v47 = vpack.c.bf16 %v243_v46, %v242_v45  ;;  %v244_v48 = vld [vmem:[#allocation7 + $0x40] sm:$0xff]  ;;  %v245_v49 = vld [vmem:[#allocation7 + $0x48] sm:$0xff]  ;;  %v246_v51 = vld [vmem:[#allocation7 + $0x50] sm:$0xff] }
  0x53   :  { %703 = vmatpush3.bf16.msra.mxu1 %v700_v39  ;;  %v716_v50 = vpack.c.bf16 %v245_v49, %v244_v48  ;;  %v247_v52 = vld [vmem:[#allocation7 + $0x58] sm:$0xff]  ;;  %v248_v54 = vld [vmem:[#allocation7 + $0x60] sm:$0xff]  ;;  %v249_v55 = vld [vmem:[#allocation7 + $0x68] sm:$0xff] }
  0x54   :  { %705 = vmatprep.subr.bf16.mxu1 %v704_v41  ;;  %v720_v53 = vpack.c.bf16 %v247_v52, %v246_v51  ;;  %v724_v56 = vpack.c.bf16 %v249_v55, %v248_v54  ;;  %v250_v57 = vld [vmem:[#allocation7 + $0x70] sm:$0xff]  ;;  %v251_v58 = vld [vmem:[#allocation7 + $0x78] sm:$0xff]  ;;  %v385_v38 = vld [vmem:[#allocation8 + $0x20] sm:$0xff] }
  0x55   :  { %679 = vmatpush3.bf16.msra.mxu0 %v676_v8  ;;  %v728_v59 = vpack.c.bf16 %v251_v58, %v250_v57  ;;  %v500_v3 = vld [vmem:[%s1076_s2] ss:$0 sm:$0xff]  ;;  %v384_v36 = vld [vmem:[#allocation8 + $0x18] sm:$0xff]  ;;  %v386_v39 = vld [vmem:[#allocation8 + $0x28] sm:$0xff] }
  0x56   :  { %681 = vmatprep.subr.bf16.mxu0 %v680_v12  ;;  %v501_v5 = vld [vmem:[%s1077_s3] ss:$0 sm:$0xff]  ;;  %v740_v40 = vpack.c.bf16 %v386_v39, %v385_v38  ;;  %v388_v42 = vld [vmem:[#allocation8 + $0x38] sm:$0xff]  ;;  %v390_v45 = vld [vmem:[#allocation8 + $0x48] sm:$0xff] }
  0x57   :  { %707 = vmatpush3.bf16.msra.mxu1 %v704_v41  ;;  %v387_v41 = vld [vmem:[#allocation8 + $0x30] sm:$0xff]  ;;  %v392_v48 = vld [vmem:[#allocation8 + $0x58] sm:$0xff]  ;;  %v394_v51 = vld [vmem:[#allocation8 + $0x68] sm:$0xff] }
  0x58   :  { %709 = vmatprep.subr.bf16.mxu1 %v708_v44  ;;  %v744_v43 = vpack.c.bf16 %v388_v42, %v387_v41  ;;  %v396_v54 = vld [vmem:[#allocation8 + $0x78] sm:$0xff] }
  0x59   :  { %683 = vmatpush3.bf16.msra.mxu0 %v680_v12 }
  0x5a   :  { %685 = vmatprep.subr.bf16.mxu0 %v684_v15 }
  0x5b   :  { %711 = vmatpush3.bf16.msra.mxu1 %v708_v44  ;;  %v389_v44 = vld [vmem:[#allocation8 + $0x40] sm:$0xff] }
  0x5c   :  { %713 = vmatprep.subr.bf16.mxu1 %v712_v47  ;;  %v748_v46 = vpack.c.bf16 %v390_v45, %v389_v44 }
  0x5d   :  { %687 = vmatpush3.bf16.msra.mxu0 %v684_v15 }
  0x5e   :  { %689 = vmatprep.subr.bf16.mxu0 %v688_v18 }
  0x5f   :  { %715 = vmatpush3.bf16.msra.mxu1 %v712_v47  ;;  %v391_v47 = vld [vmem:[#allocation8 + $0x50] sm:$0xff] }
  0x60   :  { %717 = vmatprep.subr.bf16.mxu1 %v716_v50  ;;  %v752_v49 = vpack.c.bf16 %v392_v48, %v391_v47 }
  0x61   :  { %691 = vmatpush3.bf16.msra.mxu0 %v688_v18 }
  0x62   :  { %693 = vmatprep.subr.bf16.mxu0 %v692_v21 }
  0x63   :  { %719 = vmatpush3.bf16.msra.mxu1 %v716_v50  ;;  %v393_v50 = vld [vmem:[#allocation8 + $0x60] sm:$0xff] }
  0x64   :  { %721 = vmatprep.subr.bf16.mxu1 %v720_v53  ;;  %v756_v52 = vpack.c.bf16 %v394_v51, %v393_v50 }
  0x65   :  { %695 = vmatpush3.bf16.msra.mxu0 %v692_v21 }
  0x66   :  { %697 = vmatprep.subr.bf16.mxu0 %v696_v24 }
  0x67   :  { %723 = vmatpush3.bf16.msra.mxu1 %v720_v53  ;;  %v395_v53 = vld [vmem:[#allocation8 + $0x70] sm:$0xff] }
  0x68   :  { %725 = vmatprep.subr.bf16.mxu1 %v724_v56  ;;  %v760_v55 = vpack.c.bf16 %v396_v54, %v395_v53 }
  0x69   :  { %699 = vmatpush3.bf16.msra.mxu0 %v696_v24 }
  0x6b   :  { %727 = vmatpush3.bf16.msra.mxu1 %v724_v56 }
  0x6c   :  { %596 = vmatmul.mubr.f32.vlgmr.msra.gmra.mrb[0].mxu0 %v89_v25  ;;  %729 = vmatprep.subr.bf16.mxu1 %v728_v59 }
  0x6f   :  { %731 = vmatpush3.bf16.msra.mxu1 %v728_v59 }
 0x13f   :  { %v597_v26 = vpop.f32.mrb[0].mxu0 }
 0x140   :  { %v174_v27 = vpop.f32.mrb[1].mxu0 }
 0x141   :  { %183 = vadd.xlane.f32.xlu0 %v174_v27 }
 0x145   :  { %185 = vadd.xlane.f32.xlu0 %v597_v26 }
 0x1ce   :  { %v184_v28 = vpop.xlane.xlu0 %183 }
 0x1cf   :  { %v188_v29 = vmul.f32 0.0078125, %v184_v28 }
 0x1d1   :  { %v190_v30 = vsub.f32 %v174_v27, %v188_v29 }
 0x1d2   :  { %v186_v31 = vpop.xlane.xlu0 %185 }
 0x1d3   :  { %v189_v32 = vmul.f32 0.0078125, %v186_v31  ;;  %v192_v33 = vmul.f32 %v190_v30, %v190_v30 }
 0x1d5   :  { %v191_v34 = vsub.f32 %v597_v26, %v189_v32  ;;  %194 = vadd.xlane.f32.xlu1 %v192_v33  ;;  %v381_v32 = vld [vmem:[#allocation8] sm:$0xff]  ;;  %v382_v33 = vld [vmem:[#allocation8 + $0x8] sm:$0xff] }
 0x1d7   :  { %v193_v35 = vmul.f32 %v191_v34, %v191_v34 }
 0x1d9   :  { %196 = vadd.xlane.f32.xlu1 %v193_v35  ;;  %v732_v35 = vpack.c.bf16 %v382_v33, %v381_v32 }
 0x1db   :  { %733 = vmatprep.subr.bf16.mxu0 %v732_v35 }
 0x1dc   :  { %735 = vmatpush3.bf16.msra.mxu0 %v732_v35 }
 0x262   :  { %v195_v60 = vpop.xlane.xlu1 %194 }
 0x263   :  { %v198_v61 = vmul.f32 0.0078125, %v195_v60 }
 0x265   :  { %v200_v62 = vadd.f32 0.001, %v198_v61 }
 0x266   :  { %v197_v63 = vpop.xlane.xlu1 %196 }
 0x267   :  { %771 = vrsqrt.f32 %v200_v62  ;;  %v199_v0 = vmul.f32 0.0078125, %v197_v63  ;;  %v504_v63 = vld [vmem:[%s1079_s5] ss:$0 sm:$0xff] }
 0x269   :  { %v201_v1 = vadd.f32 0.001, %v199_v0 }
 0x26b   :  { %773 = vrsqrt.f32 %v201_v1 }
 0x271   :  { %v772_v2 = vpop.eup %771 }
 0x272   :  { %v204_v4 = vmul.f32 %v772_v2, %v190_v30  ;;  %v505_v2 = vld [vmem:[%s1080_s6] ss:$0 sm:$0xff] }
 0x274   :  { %v212_v6 = vmul.f32 %v500_v3, %v204_v4 }
 0x275   :  { %v774_v7 = vpop.eup %773 }
 0x276   :  { %v205_v8 = vmul.f32 %v774_v7, %v191_v34  ;;  %v220_v9 = vadd.f32 %v501_v5, %v212_v6  ;;  %v383_v34 = vld [vmem:[#allocation8 + $0x10] sm:$0xff] }
 0x277   :  { %v736_v37 = vpack.c.bf16 %v384_v36, %v383_v34 }
 0x278   :  { %v213_v10 = vmul.f32 %v500_v3, %v205_v8  ;;  %v502_v11 = vmul.f32 -1.442695, %v220_v9 }
 0x279   :  { %737 = vmatprep.subr.bf16.mxu0 %v736_v37 }
 0x27a   :  { %v221_v12 = vadd.f32 %v501_v5, %v213_v10  ;;  %775 = vpow2.f32 %v502_v11  ;;  %739 = vmatpush3.bf16.msra.mxu0 %v736_v37 }
 0x27b   :  { %741 = vmatprep.subr.bf16.mxu0 %v740_v40 }
 0x27c   :  { %v503_v13 = vmul.f32 -1.442695, %v221_v12 }
 0x27e   :  { %777 = vpow2.f32 %v503_v13  ;;  %743 = vmatpush3.bf16.msra.mxu0 %v740_v40 }
 0x27f   :  { %745 = vmatprep.subr.bf16.mxu0 %v744_v43 }
 0x282   :  { %747 = vmatpush3.bf16.msra.mxu0 %v744_v43 }
 0x283   :  { %749 = vmatprep.subr.bf16.mxu0 %v748_v46 }
 0x284   :  { %v776_v14 = vpop.eup %775 }
 0x285   :  { %v228_v15 = vadd.f32 1.0, %v776_v14 }
 0x286   :  { %751 = vmatpush3.bf16.msra.mxu0 %v748_v46 }
 0x287   :  { %779 = vrcp.f32 %v228_v15  ;;  %753 = vmatprep.subr.bf16.mxu0 %v752_v49 }
 0x288   :  { %v778_v16 = vpop.eup %777 }
 0x289   :  { %v229_v17 = vadd.f32 1.0, %v778_v16 }
 0x28a   :  { %755 = vmatpush3.bf16.msra.mxu0 %v752_v49 }
 0x28b   :  { %781 = vrcp.f32 %v229_v17  ;;  %757 = vmatprep.subr.bf16.mxu0 %v756_v52 }
 0x28e   :  { %759 = vmatpush3.bf16.msra.mxu0 %v756_v52 }
 0x28f   :  { %761 = vmatprep.subr.bf16.mxu0 %v760_v55 }
 0x291   :  { %v780_v18 = vpop.eup %779 }
 0x292   :  { %v234_v19 = vmul.f32 %v780_v18, %v220_v9  ;;  %763 = vmatpush3.bf16.msra.mxu0 %v760_v55  ;;  %v508_v18 = vld [vmem:[%s1082_s8] ss:$0 sm:$0xff] }
 0x294   :  { %630 = vmatprep.mubr.f32.mxu1 %v234_v19 }
 0x295   :  { %v782_v20 = vpop.eup %781 }
 0x296   :  { %v235_v21 = vmul.f32 %v782_v20, %v221_v12 }
 0x298   :  { %631 = vmatmul.mubr.f32.vlgmr.msra.gmra.mrb[0].mxu1 %v235_v21 }
 0x36b   :  { %v632_v22 = vpop.f32.mrb[0].mxu1 }
 0x36c   :  { %331 = vadd.xlane.f32.xlu1 %v632_v22  ;;  %v320_v23 = vpop.f32.mrb[1].mxu1 }
 0x36d   :  { %329 = vadd.xlane.f32.xlu0 %v320_v23 }
 0x3f9   :  { %v332_v24 = vpop.xlane.xlu1 %331 }
 0x3fa   :  { %v334_v25 = vmul.f32 0.0078125, %v332_v24  ;;  %v330_v26 = vpop.xlane.xlu0 %329 }
 0x3fb   :  { %v333_v27 = vmul.f32 0.0078125, %v330_v26 }
 0x3fc   :  { %v336_v28 = vsub.f32 %v632_v22, %v334_v25 }
 0x3fd   :  { %v335_v29 = vsub.f32 %v320_v23, %v333_v27 }
 0x3fe   :  { %v338_v30 = vmul.f32 %v336_v28, %v336_v28 }
 0x3ff   :  { %v337_v31 = vmul.f32 %v335_v29, %v335_v29 }
 0x400   :  { %341 = vadd.xlane.f32.xlu1 %v338_v30 }
 0x401   :  { %339 = vadd.xlane.f32.xlu0 %v337_v31 }
 0x48d   :  { %v342_v56 = vpop.xlane.xlu1 %341 }
 0x48e   :  { %v344_v57 = vmul.f32 0.0078125, %v342_v56  ;;  %v340_v58 = vpop.xlane.xlu0 %339 }
 0x48f   :  { %v343_v59 = vmul.f32 0.0078125, %v340_v58 }
 0x490   :  { %v346_v60 = vadd.f32 0.001, %v344_v57 }
 0x491   :  { %v345_v61 = vadd.f32 0.001, %v343_v59 }
 0x492   :  { %783 = vrsqrt.f32 %v346_v60 }
 0x493   :  { %785 = vrsqrt.f32 %v345_v61 }
 0x49c   :  { %v784_v62 = vpop.eup %783 }
 0x49d   :  { %v786_v0 = vpop.eup %785  ;;  %v350_v1 = vmul.f32 %v784_v62, %v336_v28 }
 0x49e   :  { %v349_v3 = vmul.f32 %v786_v0, %v335_v29 }
 0x49f   :  { %v358_v4 = vmul.f32 %v504_v63, %v350_v1 }
 0x4a0   :  { %v357_v5 = vmul.f32 %v504_v63, %v349_v3 }
 0x4a1   :  { %v366_v6 = vadd.f32 %v505_v2, %v358_v4 }
 0x4a2   :  { %v365_v7 = vadd.f32 %v505_v2, %v357_v5 }
 0x4a3   :  { %v507_v8 = vmul.f32 -1.442695, %v366_v6 }
 0x4a4   :  { %v506_v9 = vmul.f32 -1.442695, %v365_v7 }
 0x4a5   :  { %787 = vpow2.f32 %v507_v8 }
 0x4a6   :  { %789 = vpow2.f32 %v506_v9 }
 0x4af   :  { %v788_v10 = vpop.eup %787 }
 0x4b0   :  { %v790_v11 = vpop.eup %789  ;;  %v374_v12 = vadd.f32 1.0, %v788_v10 }
 0x4b1   :  { %v373_v13 = vadd.f32 1.0, %v790_v11 }
 0x4b2   :  { %791 = vrcp.f32 %v374_v12 }
 0x4b3   :  { %793 = vrcp.f32 %v373_v13 }
 0x4bc   :  { %v792_v14 = vpop.eup %791 }
 0x4bd   :  { %v794_v15 = vpop.eup %793  ;;  %v380_v17 = vmul.f32 %v792_v14, %v366_v6 }
 0x4be   :  { %v379_v16 = vmul.f32 %v794_v15, %v365_v7 }
 0x4c0   :  { %665 = vmatprep.mubr.f32.mxu0 %v379_v16 }
 0x4c1   :  { %666 = vmatmul.mubr.f32.vlgmr.msra.gmra.mrb[2].mxu0 %v380_v17 }
 0x594   :  { %v667_v19 = vpop.f32.mrb[2].mxu0 }
 0x595   :  { %v476_v20 = vadd.f32 %v667_v19, %v508_v18  ;;  %v470_v21 = vpop.f32.mrb[3].mxu0 }
 0x596   :  { %v471_v22 = vadd.f32 %v508_v18, %v470_v21 }
 0x597   :  { %480 = vst [vmem:[#allocation10 + $0x8] sm:$0xff] %v476_v20 }
 0x598   :  { %479 = vst [vmem:[#allocation10] sm:$0xff] %v471_v22 }
 0x599   :  { %894 = shalt.err (!%p891_p8)
}
 0x59a   :  { %s895_s8 = scalar_lea.hbm %s1083_s9, 256 }
 0x59b   :  { %p896_p9 = scmp.ne.s32.totalorder %s1083_s9, %s895_s8  ;;  %p899_p10 = scmp.lt.u32.totalorder %s895_s8, %s1083_s9 }
 0x59d   :  { %p901_p11 = pnand %p899_p10, %p896_p9 }
 0x59f   :  { %904 = shalt.err (!%p901_p11)
}
 0x5a0   :  { %492 = dma.vmem_to_hbm [thread:$0]  %s487_s24, 256, %s1083_s9, [#allocation4], %s915_s21, %s915_s21, %s916_s22  }
 0x5a1   :  { %911 = dma.done.wait [#allocation4], 256  }
 0x5a2   :  { %912 = vsyncadd [#allocation4], 4294967040 }
 0x5a3   :  { %496 = vsyncpa [#allocation3], 1 }
 0x5a4   :  { %497 = vsyncpa [#allocation6], 1 }
 0x5a5   :  { %498 = vsyncpa [#allocation9], 1 }
 0x5a6   :  { %499 = vsyncpa [#allocation4], 1 }

// kernel: tpu_custom_call.1
= control target key start
LH: loop header
LB: loop body
LE: loop exit
PB: predicated region body
PF: predicated region fallthrough
CT: control target
= control target key end

     0   :  { %14 = vsyncpa [#allocation3], 0  ;;  %s1074_s0 = inlined_call_operand.hbm [shape: f32[16,128], index: 0, kind: input, shape index: {}]   ;;  %s1075_s1 = inlined_call_operand.hbm [shape: f32[128,128], index: 1, kind: input, shape index: {}]   ;;  %s1076_s2 = inlined_call_operand.vmem [shape: f32[1,128], index: 2, kind: input, shape index: {}]   ;;  %s1077_s3 = inlined_call_operand.vmem [shape: f32[1,128], index: 3, kind: input, shape index: {}]   ;;  %s1078_s4 = inlined_call_operand.hbm [shape: f32[128,128], index: 4, kind: input, shape index: {}]   ;;  %s1079_s5 = inlined_call_operand.vmem [shape: f32[1,128], index: 5, kind: input, shape index: {}]   ;;  %s1080_s6 = inlined_call_operand.vmem [shape: f32[1,128], index: 6, kind: input, shape index: {}]   ;;  %s1081_s7 = inlined_call_operand.hbm [shape: f32[128,128], index: 7, kind: input, shape index: {}]   ;;  %s1082_s8 = inlined_call_operand.vmem [shape: f32[1,128], index: 8, kind: input, shape index: {}]   ;;  %s1083_s9 = inlined_call_operand.hbm [shape: f32[16,128], index: 9, kind: output, shape index: {}]  }
   0x1   :  { %15 = vsyncpa [#allocation6], 0 }
   0x2   :  { %16 = vsyncpa [#allocation9], 0 }
   0x3   :  { %17 = vsyncpa [#allocation4], 0  ;;  %s913_s30 = smov [#allocation5]   ;;  %s914_s11 = smov [#allocation2]  }
   0x4   :  { %s35_s10 = sshll.u32 %s913_s30, 4  ;;  %s23_s12 = sshll.u32 %s914_s11, 4  ;;  %s36_s10 = int_to_ptr.vmem [resolvable:$true] %s35_s10  ;;  %s970_s12 = int_to_ptr.vmem [resolvable:$true] %s23_s12 }
   0x5   :  { %s795_s15 = scalar_lea.hbm %s1075_s1, 2048 }
   0x6   :  { %p796_p0 = scmp.ne.s32.totalorder %s1075_s1, %s795_s15  ;;  %p799_p1 = scmp.lt.u32.totalorder %s795_s15, %s1075_s1 }
   0x8   :  { %p801_p2 = pnand %p799_p1, %p796_p0 }
   0xa   :  { %804 = shalt.err (!%p801_p2)
}
   0xb   :  { %s805_s20 = scalar_lea.vmem %s36_s10, 2048  ;;  %p810_p4 = scmp.lt.s32.totalorder %s36_s10, %s36_s10 }
   0xc   :  { %p806_p3 = scmp.ne.s32.totalorder %s36_s10, %s805_s20  ;;  %p811_p5 = scmp.lt.s32.totalorder %s805_s20, %s805_s20 }
   0xe   :  { %p812_p6 = por %p811_p5, %p810_p4 }
  0x10   :  { %p813_p7 = pnand %p812_p6, %p806_p3 }
  0x12   :  { %816 = shalt.err (!%p813_p7)
}
  0x13   :  { %s915_s21 = smov 128   ;;  %s916_s22 = smov 8  }
  0x14   :  { %41 = dma.hbm_to_vmem [thread:$0]  %s1075_s1, 2048, %s36_s10, [#allocation6], %s915_s21, %s915_s21, %s916_s22  }
  0x15   :  { %s817_s27 = scalar_lea.hbm %s1074_s0, 256 }
  0x16   :  { %p818_p8 = scmp.ne.s32.totalorder %s1074_s0, %s817_s27  ;;  %p821_p9 = scmp.lt.u32.totalorder %s817_s27, %s1074_s0 }
  0x18   :  { %p823_p10 = pnand %p821_p9, %p818_p8 }
  0x1a   :  { %826 = shalt.err (!%p823_p10)
}
  0x1b   :  { %s827_s13 = scalar_lea.vmem %s970_s12, 256  ;;  %p832_p12 = scmp.lt.s32.totalorder %s970_s12, %s970_s12 }
  0x1c   :  { %p828_p11 = scmp.ne.s32.totalorder %s970_s12, %s827_s13  ;;  %p833_p13 = scmp.lt.s32.totalorder %s827_s13, %s827_s13 }
  0x1e   :  { %p834_p0 = por %p833_p13, %p832_p12 }
  0x20   :  { %p835_p1 = pnand %p834_p0, %p828_p11 }
  0x22   :  { %838 = shalt.err (!%p835_p1)
}
  0x23   :  { %29 = dma.hbm_to_vmem [thread:$0]  %s1074_s0, 256, %s970_s12, [#allocation3], %s915_s21, %s915_s21, %s916_s22  }
  0x24   :  { %s917_s14 = smov [#allocation7]   ;;  %s918_s16 = smov [#allocation8]  }
  0x25   :  { %s51_s15 = sshll.u32 %s917_s14, 4  ;;  %s67_s17 = sshll.u32 %s918_s16, 4  ;;  %s52_s15 = int_to_ptr.vmem [resolvable:$true] %s51_s15  ;;  %s1007_s17 = int_to_ptr.vmem [resolvable:$true] %s67_s17 }
  0x26   :  { %s839_s20 = scalar_lea.hbm %s1078_s4, 2048 }
  0x27   :  { %p840_p2 = scmp.ne.s32.totalorder %s1078_s4, %s839_s20  ;;  %p843_p3 = scmp.lt.u32.totalorder %s839_s20, %s1078_s4 }
  0x29   :  { %p845_p4 = pnand %p843_p3, %p840_p2 }
  0x2b   :  { %848 = shalt.err (!%p845_p4)
}
  0x2c   :  { %s849_s0 = scalar_lea.vmem %s52_s15, 2048  ;;  %p854_p6 = scmp.lt.s32.totalorder %s52_s15, %s52_s15 }
  0x2d   :  { %p850_p5 = scmp.ne.s32.totalorder %s52_s15, %s849_s0  ;;  %p855_p7 = scmp.lt.s32.totalorder %s849_s0, %s849_s0 }
  0x2f   :  { %p856_p8 = por %p855_p7, %p854_p6 }
  0x31   :  { %p857_p9 = pnand %p856_p8, %p850_p5 }
  0x33   :  { %860 = shalt.err (!%p857_p9)
}
  0x34   :  { %57 = dma.hbm_to_vmem [thread:$0]  %s1078_s4, 2048, %s52_s15, [#allocation6], %s915_s21, %s915_s21, %s916_s22  }
  0x35   :  { %s861_s30 = scalar_lea.hbm %s1081_s7, 2048 }
  0x36   :  { %p862_p10 = scmp.ne.s32.totalorder %s1081_s7, %s861_s30  ;;  %p865_p11 = scmp.lt.u32.totalorder %s861_s30, %s1081_s7 }
  0x38   :  { %p867_p12 = pnand %p865_p11, %p862_p10 }
  0x3a   :  { %870 = shalt.err (!%p867_p12)
}
  0x3b   :  { %s871_s14 = scalar_lea.vmem %s1007_s17, 2048  ;;  %p876_p0 = scmp.lt.s32.totalorder %s1007_s17, %s1007_s17 }
  0x3c   :  { %p872_p13 = scmp.ne.s32.totalorder %s1007_s17, %s871_s14  ;;  %p877_p1 = scmp.lt.s32.totalorder %s871_s14, %s871_s14 }
  0x3e   :  { %p878_p2 = por %p877_p1, %p876_p0 }
  0x40   :  { %p879_p3 = pnand %p878_p2, %p872_p13 }
  0x42   :  { %882 = shalt.err (!%p879_p3)
}
  0x43   :  { %73 = dma.hbm_to_vmem [thread:$0]  %s1081_s7, 2048, %s1007_s17, [#allocation9], %s915_s21, %s915_s21, %s916_s22  }
  0x44   :  { %905 = dma.done.wait [#allocation3], 256  }
  0x45   :  { %906 = vsyncadd [#allocation3], 4294967040 }
  0x46   :  { %907 = dma.done.wait [#allocation6], 4096  }
  0x47   :  { %908 = vsyncadd [#allocation6], 4294963200 }
  0x48   :  { %909 = dma.done.wait [#allocation9], 2048  }
  0x49   :  { %910 = vsyncadd [#allocation9], 4294965248  ;;  %v90_v0 = vld [vmem:[#allocation5] sm:$0xff]  ;;  %v91_v1 = vld [vmem:[#allocation5 + $0x8] sm:$0xff]  ;;  %s919_s23 = smov [#allocation10]  }
  0x4a   :  { %v92_v2 = vld [vmem:[#allocation5 + $0x10] sm:$0xff]  ;;  %v668_v3 = vpack.c.bf16 %v91_v1, %v90_v0  ;;  %v93_v4 = vld [vmem:[#allocation5 + $0x18] sm:$0xff]  ;;  %v94_v6 = vld [vmem:[#allocation5 + $0x20] sm:$0xff]  ;;  %s486_s24 = sshll.u32 %s919_s23, 4  ;;  %s487_s24 = int_to_ptr.vmem [resolvable:$true] %s486_s24 }
  0x4b   :  { %v672_v5 = vpack.c.bf16 %v93_v4, %v92_v2  ;;  %v95_v7 = vld [vmem:[#allocation5 + $0x28] sm:$0xff]  ;;  %v88_v9 = vld [vmem:[#allocation2] sm:$0xff]  ;;  %v97_v11 = vld [vmem:[#allocation5 + $0x38] sm:$0xff]  ;;  %s883_s25 = scalar_lea.vmem %s487_s24, 256  ;;  %p888_p5 = scmp.lt.s32.totalorder %s487_s24, %s487_s24 }
  0x4c   :  { %669 = vmatprep.subr.bf16.mxu0 %v668_v3  ;;  %v676_v8 = vpack.c.bf16 %v95_v7, %v94_v6  ;;  %v96_v10 = vld [vmem:[#allocation5 + $0x30] sm:$0xff]  ;;  %595 = vmatprep.mubr.f32.mxu0 %v88_v9  ;;  %v98_v13 = vld [vmem:[#allocation5 + $0x40] sm:$0xff]  ;;  %v99_v14 = vld [vmem:[#allocation5 + $0x48] sm:$0xff]  ;;  %p884_p4 = scmp.ne.s32.totalorder %s487_s24, %s883_s25  ;;  %p889_p6 = scmp.lt.s32.totalorder %s883_s25, %s883_s25 }
  0x4d   :  { %671 = vmatpush3.bf16.msra.mxu0 %v668_v3  ;;  %v680_v12 = vpack.c.bf16 %v97_v11, %v96_v10  ;;  %v684_v15 = vpack.c.bf16 %v99_v14, %v98_v13  ;;  %v100_v16 = vld [vmem:[#allocation5 + $0x50] sm:$0xff]  ;;  %v101_v17 = vld [vmem:[#allocation5 + $0x58] sm:$0xff]  ;;  %v102_v19 = vld [vmem:[#allocation5 + $0x60] sm:$0xff] }
  0x4e   :  { %673 = vmatprep.subr.bf16.mxu0 %v672_v5  ;;  %v688_v18 = vpack.c.bf16 %v101_v17, %v100_v16  ;;  %v103_v20 = vld [vmem:[#allocation5 + $0x68] sm:$0xff]  ;;  %v104_v22 = vld [vmem:[#allocation5 + $0x70] sm:$0xff]  ;;  %v105_v23 = vld [vmem:[#allocation5 + $0x78] sm:$0xff]  ;;  %p890_p7 = por %p889_p6, %p888_p5 }
  0x4f   :  { %v692_v21 = vpack.c.bf16 %v103_v20, %v102_v19  ;;  %v696_v24 = vpack.c.bf16 %v105_v23, %v104_v22  ;;  %v89_v25 = vld [vmem:[#allocation2 + $0x8] sm:$0xff]  ;;  %v236_v36 = vld [vmem:[#allocation7] sm:$0xff]  ;;  %v237_v37 = vld [vmem:[#allocation7 + $0x8] sm:$0xff] }
  0x50   :  { %v238_v38 = vld [vmem:[#allocation7 + $0x10] sm:$0xff]  ;;  %v700_v39 = vpack.c.bf16 %v237_v37, %v236_v36  ;;  %v239_v40 = vld [vmem:[#allocation7 + $0x18] sm:$0xff]  ;;  %v240_v42 = vld [vmem:[#allocation7 + $0x20] sm:$0xff]  ;;  %p891_p8 = pnand %p890_p7, %p884_p4 }
  0x51   :  { %675 = vmatpush3.bf16.msra.mxu0 %v672_v5  ;;  %v704_v41 = vpack.c.bf16 %v239_v40, %v238_v38  ;;  %v241_v43 = vld [vmem:[#allocation7 + $0x28] sm:$0xff]  ;;  %v242_v45 = vld [vmem:[#allocation7 + $0x30] sm:$0xff]  ;;  %v243_v46 = vld [vmem:[#allocation7 + $0x38] sm:$0xff] }
  0x52   :  { %677 = vmatprep.subr.bf16.mxu0 %v676_v8  ;;  %701 = vmatprep.subr.bf16.mxu1 %v700_v39  ;;  %v708_v44 = vpack.c.bf16 %v241_v43, %v240_v42  ;;  %v712_v47 = vpack.c.bf16 %v243_v46, %v242_v45  ;;  %v244_v48 = vld [vmem:[#allocation7 + $0x40] sm:$0xff]  ;;  %v245_v49 = vld [vmem:[#allocation7 + $0x48] sm:$0xff]  ;;  %v246_v51 = vld [vmem:[#allocation7 + $0x50] sm:$0xff] }
  0x53   :  { %703 = vmatpush3.bf16.msra.mxu1 %v700_v39  ;;  %v716_v50 = vpack.c.bf16 %v245_v49, %v244_v48  ;;  %v247_v52 = vld [vmem:[#allocation7 + $0x58] sm:$0xff]  ;;  %v248_v54 = vld [vmem:[#allocation7 + $0x60] sm:$0xff]  ;;  %v249_v55 = vld [vmem:[#allocation7 + $0x68] sm:$0xff] }
  0x54   :  { %705 = vmatprep.subr.bf16.mxu1 %v704_v41  ;;  %v720_v53 = vpack.c.bf16 %v247_v52, %v246_v51  ;;  %v724_v56 = vpack.c.bf16 %v249_v55, %v248_v54  ;;  %v250_v57 = vld [vmem:[#allocation7 + $0x70] sm:$0xff]  ;;  %v251_v58 = vld [vmem:[#allocation7 + $0x78] sm:$0xff]  ;;  %v385_v38 = vld [vmem:[#allocation8 + $0x20] sm:$0xff] }
  0x55   :  { %679 = vmatpush3.bf16.msra.mxu0 %v676_v8  ;;  %v728_v59 = vpack.c.bf16 %v251_v58, %v250_v57  ;;  %v500_v3 = vld [vmem:[%s1076_s2] ss:$0 sm:$0xff]  ;;  %v384_v36 = vld [vmem:[#allocation8 + $0x18] sm:$0xff]  ;;  %v386_v39 = vld [vmem:[#allocation8 + $0x28] sm:$0xff] }
  0x56   :  { %681 = vmatprep.subr.bf16.mxu0 %v680_v12  ;;  %v501_v5 = vld [vmem:[%s1077_s3] ss:$0 sm:$0xff]  ;;  %v740_v40 = vpack.c.bf16 %v386_v39, %v385_v38  ;;  %v388_v42 = vld [vmem:[#allocation8 + $0x38] sm:$0xff]  ;;  %v390_v45 = vld [vmem:[#allocation8 + $0x48] sm:$0xff] }
  0x57   :  { %707 = vmatpush3.bf16.msra.mxu1 %v704_v41  ;;  %v387_v41 = vld [vmem:[#allocation8 + $0x30] sm:$0xff]  ;;  %v392_v48 = vld [vmem:[#allocation8 + $0x58] sm:$0xff]  ;;  %v394_v51 = vld [vmem:[#allocation8 + $0x68] sm:$0xff] }
  0x58   :  { %709 = vmatprep.subr.bf16.mxu1 %v708_v44  ;;  %v744_v43 = vpack.c.bf16 %v388_v42, %v387_v41  ;;  %v396_v54 = vld [vmem:[#allocation8 + $0x78] sm:$0xff] }
  0x59   :  { %683 = vmatpush3.bf16.msra.mxu0 %v680_v12 }
  0x5a   :  { %685 = vmatprep.subr.bf16.mxu0 %v684_v15 }
  0x5b   :  { %711 = vmatpush3.bf16.msra.mxu1 %v708_v44  ;;  %v389_v44 = vld [vmem:[#allocation8 + $0x40] sm:$0xff] }
  0x5c   :  { %713 = vmatprep.subr.bf16.mxu1 %v712_v47  ;;  %v748_v46 = vpack.c.bf16 %v390_v45, %v389_v44 }
  0x5d   :  { %687 = vmatpush3.bf16.msra.mxu0 %v684_v15 }
  0x5e   :  { %689 = vmatprep.subr.bf16.mxu0 %v688_v18 }
  0x5f   :  { %715 = vmatpush3.bf16.msra.mxu1 %v712_v47  ;;  %v391_v47 = vld [vmem:[#allocation8 + $0x50] sm:$0xff] }
  0x60   :  { %717 = vmatprep.subr.bf16.mxu1 %v716_v50  ;;  %v752_v49 = vpack.c.bf16 %v392_v48, %v391_v47 }
  0x61   :  { %691 = vmatpush3.bf16.msra.mxu0 %v688_v18 }
  0x62   :  { %693 = vmatprep.subr.bf16.mxu0 %v692_v21 }
  0x63   :  { %719 = vmatpush3.bf16.msra.mxu1 %v716_v50  ;;  %v393_v50 = vld [vmem:[#allocation8 + $0x60] sm:$0xff] }
  0x64   :  { %721 = vmatprep.subr.bf16.mxu1 %v720_v53  ;;  %v756_v52 = vpack.c.bf16 %v394_v51, %v393_v50 }
  0x65   :  { %695 = vmatpush3.bf16.msra.mxu0 %v692_v21 }
  0x66   :  { %697 = vmatprep.subr.bf16.mxu0 %v696_v24 }
  0x67   :  { %723 = vmatpush3.bf16.msra.mxu1 %v720_v53  ;;  %v395_v53 = vld [vmem:[#allocation8 + $0x70] sm:$0xff] }
  0x68   :  { %725 = vmatprep.subr.bf16.mxu1 %v724_v56  ;;  %v760_v55 = vpack.c.bf16 %v396_v54, %v395_v53 }
  0x69   :  { %699 = vmatpush3.bf16.msra.mxu0 %v696_v24 }
  0x6b   :  { %727 = vmatpush3.bf16.msra.mxu1 %v724_v56 }
  0x6c   :  { %596 = vmatmul.mubr.f32.vlgmr.msra.gmra.mrb[0].mxu0 %v89_v25  ;;  %729 = vmatprep.subr.bf16.mxu1 %v728_v59 }
  0x6f   :  { %731 = vmatpush3.bf16.msra.mxu1 %v728_v59 }
 0x13f   :  { %v597_v26 = vpop.f32.mrb[0].mxu0 }
 0x140   :  { %v174_v27 = vpop.f32.mrb[1].mxu0 }
 0x141   :  { %183 = vadd.xlane.f32.xlu0 %v174_v27 }
 0x145   :  { %185 = vadd.xlane.f32.xlu0 %v597_v26 }
 0x1ce   :  { %v184_v28 = vpop.xlane.xlu0 %183 }
 0x1cf   :  { %v188_v29 = vmul.f32 0.0078125, %v184_v28 }
 0x1d1   :  { %v190_v30 = vsub.f32 %v174_v27, %v188_v29 }
 0x1d2   :  { %v186_v31 = vpop.xlane.xlu0 %185 }
 0x1d3   :  { %v189_v32 = vmul.f32 0.0078125, %v186_v31  ;;  %v192_v33 = vmul.f32 %v190_v30, %v190_v30 }
 0x1d5   :  { %v191_v34 = vsub.f32 %v597_v26, %v189_v32  ;;  %194 = vadd.xlane.f32.xlu1 %v192_v33  ;;  %v381_v32 = vld [vmem:[#allocation8] sm:$0xff]  ;;  %v382_v33 = vld [vmem:[#allocation8 + $0x8] sm:$0xff] }
 0x1d7   :  { %v193_v35 = vmul.f32 %v191_v34, %v191_v34 }
 0x1d9   :  { %196 = vadd.xlane.f32.xlu1 %v193_v35  ;;  %v732_v35 = vpack.c.bf16 %v382_v33, %v381_v32 }
 0x1db   :  { %733 = vmatprep.subr.bf16.mxu0 %v732_v35 }
 0x1dc   :  { %735 = vmatpush3.bf16.msra.mxu0 %v732_v35 }
 0x262   :  { %v195_v60 = vpop.xlane.xlu1 %194 }
 0x263   :  { %v198_v61 = vmul.f32 0.0078125, %v195_v60 }
 0x265   :  { %v200_v62 = vadd.f32 0.001, %v198_v61 }
 0x266   :  { %v197_v63 = vpop.xlane.xlu1 %196 }
 0x267   :  { %771 = vrsqrt.f32 %v200_v62  ;;  %v199_v0 = vmul.f32 0.0078125, %v197_v63  ;;  %v504_v63 = vld [vmem:[%s1079_s5] ss:$0 sm:$0xff] }
 0x269   :  { %v201_v1 = vadd.f32 0.001, %v199_v0 }
 0x26b   :  { %773 = vrsqrt.f32 %v201_v1 }
 0x271   :  { %v772_v2 = vpop.eup %771 }
 0x272   :  { %v204_v4 = vmul.f32 %v772_v2, %v190_v30  ;;  %v505_v2 = vld [vmem:[%s1080_s6] ss:$0 sm:$0xff] }
 0x274   :  { %v212_v6 = vmul.f32 %v500_v3, %v204_v4 }
 0x275   :  { %v774_v7 = vpop.eup %773 }
 0x276   :  { %v205_v8 = vmul.f32 %v774_v7, %v191_v34  ;;  %v220_v9 = vadd.f32 %v501_v5, %v212_v6  ;;  %v383_v34 = vld [vmem:[#allocation8 + $0x10] sm:$0xff] }
 0x277   :  { %v736_v37 = vpack.c.bf16 %v384_v36, %v383_v34 }
 0x278   :  { %v213_v10 = vmul.f32 %v500_v3, %v205_v8  ;;  %v502_v11 = vmul.f32 -1.442695, %v220_v9 }
 0x279   :  { %737 = vmatprep.subr.bf16.mxu0 %v736_v37 }
 0x27a   :  { %v221_v12 = vadd.f32 %v501_v5, %v213_v10  ;;  %775 = vpow2.f32 %v502_v11  ;;  %739 = vmatpush3.bf16.msra.mxu0 %v736_v37 }
 0x27b   :  { %741 = vmatprep.subr.bf16.mxu0 %v740_v40 }
 0x27c   :  { %v503_v13 = vmul.f32 -1.442695, %v221_v12 }
 0x27e   :  { %777 = vpow2.f32 %v503_v13  ;;  %743 = vmatpush3.bf16.msra.mxu0 %v740_v40 }
 0x27f   :  { %745 = vmatprep.subr.bf16.mxu0 %v744_v43 }
 0x282   :  { %747 = vmatpush3.bf16.msra.mxu0 %v744_v43 }
 0x283   :  { %749 = vmatprep.subr.bf16.mxu0 %v748_v46 }
 0x284   :  { %v776_v14 = vpop.eup %775 }
 0x285   :  { %v228_v15 = vadd.f32 1.0, %v776_v14 }
 0x286   :  { %751 = vmatpush3.bf16.msra.mxu0 %v748_v46 }
 0x287   :  { %779 = vrcp.f32 %v228_v15  ;;  %753 = vmatprep.subr.bf16.mxu0 %v752_v49 }
 0x288   :  { %v778_v16 = vpop.eup %777 }
 0x289   :  { %v229_v17 = vadd.f32 1.0, %v778_v16 }
 0x28a   :  { %755 = vmatpush3.bf16.msra.mxu0 %v752_v49 }
 0x28b   :  { %781 = vrcp.f32 %v229_v17  ;;  %757 = vmatprep.subr.bf16.mxu0 %v756_v52 }
 0x28e   :  { %759 = vmatpush3.bf16.msra.mxu0 %v756_v52 }
 0x28f   :  { %761 = vmatprep.subr.bf16.mxu0 %v760_v55 }
 0x291   :  { %v780_v18 = vpop.eup %779 }
 0x292   :  { %v234_v19 = vmul.f32 %v780_v18, %v220_v9  ;;  %763 = vmatpush3.bf16.msra.mxu0 %v760_v55  ;;  %v508_v18 = vld [vmem:[%s1082_s8] ss:$0 sm:$0xff] }
 0x294   :  { %630 = vmatprep.mubr.f32.mxu1 %v234_v19 }
 0x295   :  { %v782_v20 = vpop.eup %781 }
 0x296   :  { %v235_v21 = vmul.f32 %v782_v20, %v221_v12 }
 0x298   :  { %631 = vmatmul.mubr.f32.vlgmr.msra.gmra.mrb[0].mxu1 %v235_v21 }
 0x36b   :  { %v632_v22 = vpop.f32.mrb[0].mxu1 }
 0x36c   :  { %331 = vadd.xlane.f32.xlu1 %v632_v22  ;;  %v320_v23 = vpop.f32.mrb[1].mxu1 }
 0x36d   :  { %329 = vadd.xlane.f32.xlu0 %v320_v23 }
 0x3f9   :  { %v332_v24 = vpop.xlane.xlu1 %331 }
 0x3fa   :  { %v334_v25 = vmul.f32 0.0078125, %v332_v24  ;;  %v330_v26 = vpop.xlane.xlu0 %329 }
 0x3fb   :  { %v333_v27 = vmul.f32 0.0078125, %v330_v26 }
 0x3fc   :  { %v336_v28 = vsub.f32 %v632_v22, %v334_v25 }
 0x3fd   :  { %v335_v29 = vsub.f32 %v320_v23, %v333_v27 }
 0x3fe   :  { %v338_v30 = vmul.f32 %v336_v28, %v336_v28 }
 0x3ff   :  { %v337_v31 = vmul.f32 %v335_v29, %v335_v29 }
 0x400   :  { %341 = vadd.xlane.f32.xlu1 %v338_v30 }
 0x401   :  { %339 = vadd.xlane.f32.xlu0 %v337_v31 }
 0x48d   :  { %v342_v56 = vpop.xlane.xlu1 %341 }
 0x48e   :  { %v344_v57 = vmul.f32 0.0078125, %v342_v56  ;;  %v340_v58 = vpop.xlane.xlu0 %339 }
 0x48f   :  { %v343_v59 = vmul.f32 0.0078125, %v340_v58 }
 0x490   :  { %v346_v60 = vadd.f32 0.001, %v344_v57 }
 0x491   :  { %v345_v61 = vadd.f32 0.001, %v343_v59 }
 0x492   :  { %783 = vrsqrt.f32 %v346_v60 }
 0x493   :  { %785 = vrsqrt.f32 %v345_v61 }
 0x49c   :  { %v784_v62 = vpop.eup %783 }
 0x49d   :  { %v786_v0 = vpop.eup %785  ;;  %v350_v1 = vmul.f32 %v784_v62, %v336_v28 }
 0x49e   :  { %v349_v3 = vmul.f32 %v786_v0, %v335_v29 }
 0x49f   :  { %v358_v4 = vmul.f32 %v504_v63, %v350_v1 }
 0x4a0   :  { %v357_v5 = vmul.f32 %v504_v63, %v349_v3 }
 0x4a1   :  { %v366_v6 = vadd.f32 %v505_v2, %v358_v4 }
 0x4a2   :  { %v365_v7 = vadd.f32 %v505_v2, %v357_v5 }
 0x4a3   :  { %v507_v8 = vmul.f32 -1.442695, %v366_v6 }
 0x4a4   :  { %v506_v9 = vmul.f32 -1.442695, %v365_v7 }
 0x4a5   :  { %787 = vpow2.f32 %v507_v8 }
 0x4a6   :  { %789 = vpow2.f32 %v506_v9 }
 0x4af   :  { %v788_v10 = vpop.eup %787 }
 0x4b0   :  { %v790_v11 = vpop.eup %789  ;;  %v374_v12 = vadd.f32 1.0, %v788_v10 }
 0x4b1   :  { %v373_v13 = vadd.f32 1.0, %v790_v11 }
 0x4b2   :  { %791 = vrcp.f32 %v374_v12 }
 0x4b3   :  { %793 = vrcp.f32 %v373_v13 }
 0x4bc   :  { %v792_v14 = vpop.eup %791 }
 0x4bd   :  { %v794_v15 = vpop.eup %793  ;;  %v380_v17 = vmul.f32 %v792_v14, %v366_v6 }
 0x4be   :  { %v379_v16 = vmul.f32 %v794_v15, %v365_v7 }
 0x4c0   :  { %665 = vmatprep.mubr.f32.mxu0 %v379_v16 }
 0x4c1   :  { %666 = vmatmul.mubr.f32.vlgmr.msra.gmra.mrb[2].mxu0 %v380_v17 }
 0x594   :  { %v667_v19 = vpop.f32.mrb[2].mxu0 }
 0x595   :  { %v476_v20 = vadd.f32 %v667_v19, %v508_v18  ;;  %v470_v21 = vpop.f32.mrb[3].mxu0 }
 0x596   :  { %v471_v22 = vadd.f32 %v508_v18, %v470_v21 }
 0x597   :  { %480 = vst [vmem:[#allocation10 + $0x8] sm:$0xff] %v476_v20 }
 0x598   :  { %479 = vst [vmem:[#allocation10] sm:$0xff] %v471_v22 }
 0x599   :  { %894 = shalt.err (!%p891_p8)
}
 0x59a   :  { %s895_s8 = scalar_lea.hbm %s1083_s9, 256 }
 0x59b   :  { %p896_p9 = scmp.ne.s32.totalorder %s1083_s9, %s895_s8  ;;  %p899_p10 = scmp.lt.u32.totalorder %s895_s8, %s1083_s9 }
 0x59d   :  { %p901_p11 = pnand %p899_p10, %p896_p9 }
 0x59f   :  { %904 = shalt.err (!%p901_p11)
}
 0x5a0   :  { %492 = dma.vmem_to_hbm [thread:$0]  %s487_s24, 256, %s1083_s9, [#allocation4], %s915_s21, %s915_s21, %s916_s22  }
 0x5a1   :  { %911 = dma.done.wait [#allocation4], 256  }
 0x5a2   :  { %912 = vsyncadd [#allocation4], 4294967040 }
 0x5a3   :  { %496 = vsyncpa [#allocation3], 1 }
 0x5a4   :  { %497 = vsyncpa [#allocation6], 1 }
 0x5a5   :  { %498 = vsyncpa [#allocation9], 1 }
 0x5a6   :  { %499 = vsyncpa [#allocation4], 1 }

</bundles_post_ra>
